<compile_context>
chip_gen: v6e
topology: v6e:2x2x1
jax: 0.10.0
libtpu: 0.0.40
codegen_flags: <defaults>
</compile_context>

<pallas_src>
import functools

import jax
import jax.numpy as jnp
from jax.experimental import pallas as pl
from jax.experimental.pallas import tpu as pltpu

BLOCK_SIZE = 27          # causal-mask buffer size from the module (T must be <= 27)
NUM_HEADS = 4
HEAD_SIZE = 8
N_EMBD = NUM_HEADS * HEAD_SIZE   # C = 32
LANES = 128
NEG_INF = -1e30          # finite additive mask value (no inf-inf NaN hazard)


def _mha_kernel(x_ref, wqkv_ref, wp_ref, bp_ref, mask_ref, o_ref, ctx_ref, *,
                n_units, head_size, bt_p, t_pad, gc):
    rows = bt_p * t_pad
    hs = head_size

    x = x_ref[...]                                                # (rows, GC)

    # Fused QKV projection against the block-diagonal weight (q pre-scaled).
    # q/k/v occupy GC-aligned lane blocks -> full-tile slices below.
    qkv = jnp.dot(x, wqkv_ref[...],
                  preferred_element_type=jnp.float32)             # (rows, 3*GC) f32
    q = qkv[:, 0 * gc:1 * gc].reshape(bt_p, t_pad, gc)
    k = qkv[:, 1 * gc:2 * gc].reshape(bt_p, t_pad, gc)
    v = qkv[:, 2 * gc:3 * gc].reshape(bt_p, t_pad, gc)

    # Additive causal bias, broadcast ONCE outside the unit loop.
    bias = jnp.broadcast_to(mask_ref[...][None], (bt_p, t_pad, t_pad))

    # Attention per (lane-group, head) unit; context staged lane-dense in VMEM.
    for u in range(n_units):
        lo, hi = u * hs, (u + 1) * hs
        qh = q[:, :, lo:hi]                                       # (bt_p, Tp, hs)
        kh = k[:, :, lo:hi]
        vh = v[:, :, lo:hi]

        wei = jnp.einsum('btd,bsd->bts', qh, kh,
                         preferred_element_type=jnp.float32) + bias
        m = jnp.max(wei, axis=-1, keepdims=True)
        e = jnp.exp(wei - m)
        s = jnp.sum(e, axis=-1, keepdims=True)
        p = e * pl.reciprocal(s, approx=True)                     # EUP slot

        ctx = jnp.einsum('bts,bsd->btd', p, vh,
                         preferred_element_type=jnp.float32)      # (bt_p, Tp, hs)
        ctx_ref[:, lo:hi] = ctx.reshape(rows, hs)

    # Single full-depth output projection (block-diagonal wp) + bias.
    out = jnp.dot(ctx_ref[...], wp_ref[...].astype(jnp.float32),
                  preferred_element_type=jnp.float32) + bp_ref[...]
    o_ref[...] = out.astype(o_ref.dtype)                          # full 128-lane store


def multi_head_attention(x, wk, wq, wv, wp, bp, *,
                         num_heads=NUM_HEADS, head_size=HEAD_SIZE,
                         batch_block=32):
    """x: (B, T, C); returns (B, T, C).  Eval-mode forward (dropout = identity).

    batch_block counts PACKED rows (each packed row holds G = 128//C batch elems).
    Pass a bf16 x to stream x/out (and weights) at half the HBM bytes; softmax
    and accumulation stay f32.
    """
    B, T, C = x.shape
    assert C == num_heads * head_size
    assert T <= BLOCK_SIZE

    io_dtype = x.dtype
    w_dtype = io_dtype

    # ---- lane-group packing geometry -------------------------------------
    G = LANES // C if (C <= LANES and LANES % C == 0) else 1
    gc = G * C

    # ---- one-time weight prep (trace time, outside the kernel) ------------
    scale = head_size ** (-0.5)

    def block_diag(w):
        cin, cout = w.shape
        bd = jnp.zeros((G * cin, G * cout), w.dtype)
        for g in range(G):
            bd = bd.at[g * cin:(g + 1) * cin, g * cout:(g + 1) * cout].set(w)
        return bd

    wq_bd = block_diag((wq * scale).T)                 # q columns pre-scaled
    wk_bd = block_diag(wk.T)
    wv_bd = block_diag(wv.T)
    wqkv = jnp.concatenate([wq_bd, wk_bd, wv_bd], axis=1).astype(w_dtype)  # (GC, 3GC)
    wp_bd = block_diag(wp.T).astype(w_dtype)                               # (GC, GC)
    bp_p = jnp.tile(bp.astype(jnp.float32), (G,)).reshape(1, gc)           # (1, GC) f32

    # ---- padding / tiling --------------------------------------------------
    t_mult = 8 if jnp.dtype(io_dtype).itemsize == 4 else 16
    t_pad = ((T + t_mult - 1) // t_mult) * t_mult

    bp_groups = pl.cdiv(B, G)                       # packed super-batch size
    min_blocks = 2 if bp_groups >= 2 else 1         # let v7x's 2 TensorCores both work
    num_blocks = max(min_blocks, pl.cdiv(bp_groups, batch_block))
    bt_p = pl.cdiv(bp_groups, num_blocks)
    num_blocks = pl.cdiv(bp_groups, bt_p)
    bp_pad = num_blocks * bt_p
    b_pad = bp_pad * G
    rows = bt_p * t_pad

    xp = x
    if (b_pad, t_pad) != (B, T):
        xp = jnp.pad(x, ((0, b_pad - B), (0, t_pad - T), (0, 0)))
    # (Bp*G, Tp, C) -> (Bp*Tp, G*C): G consecutive batch elems share a lane row.
    x2 = (xp.reshape(bp_pad, G, t_pad, C)
            .transpose(0, 2, 1, 3)
            .reshape(bp_pad * t_pad, gc)
            .astype(io_dtype))

    # Additive causal bias: 0 where key <= query, large finite negative elsewhere.
    row = jnp.arange(t_pad)[:, None]
    col = jnp.arange(t_pad)[None, :]
    mask = jnp.where(col <= row, 0.0, NEG_INF).astype(jnp.float32)   # (Tp, Tp)

    kernel = functools.partial(_mha_kernel, n_units=G * num_heads,
                               head_size=head_size, bt_p=bt_p, t_pad=t_pad, gc=gc)

    full = lambda shape: pl.BlockSpec(shape, lambda b, _s=shape: tuple(0 for _ in _s))

    # Raise the scoped VMEM limit only when the live set would not fit v5e's
    # 16 MiB default; cap well below v7x's 64 MiB physical VMEM.
    io_bytes = jnp.dtype(io_dtype).itemsize
    est = (4 * rows * gc * io_bytes            # double-buffered x/out slabs
           + rows * 3 * gc * 4                 # f32 QKV intermediate
           + rows * gc * 4                     # ctx scratch
           + 4 * bt_p * t_pad * t_pad * 4)     # softmax temporaries
    vmem_limit = (int(min(max(2 * est, 32 * 2**20), 48 * 2**20))
                  if est > 12 * 2**20 else None)

    out2 = pl.pallas_call(
        kernel,
        out_shape=jax.ShapeDtypeStruct((bp_pad * t_pad, gc), io_dtype),
        grid_spec=pltpu.PrefetchScalarGridSpec(
            num_scalar_prefetch=0,
            grid=(num_blocks,),
            in_specs=[
                pl.BlockSpec((rows, gc), lambda b: (b, 0)),   # packed x slab
                full((gc, 3 * gc)),                           # block-diag QKV weight
                full((gc, gc)),                               # block-diag proj weight
                full((1, gc)),                                # packed proj bias (f32)
                full((t_pad, t_pad)),                         # additive causal bias
            ],
            out_specs=pl.BlockSpec((rows, gc), lambda b: (b, 0)),
            scratch_shapes=[pltpu.VMEM((rows, gc), jnp.float32)],
        ),
        compiler_params=pltpu.CompilerParams(
            dimension_semantics=("parallel",),
            vmem_limit_bytes=vmem_limit),
    )(x2, wqkv, wp_bd, bp_p, mask)

    # Unpack lane groups back to (B, T, C).
    out = (out2.reshape(bp_pad, t_pad, G, C)
               .transpose(0, 2, 1, 3)
               .reshape(b_pad, t_pad, C))
    return out[:B, :T]


def _reference(x, wk, wq, wv, wp, bp, num_heads, head_size):
    """Plain-JAX mirror of the PyTorch forward (eval mode) for verification."""
    B, T, C = x.shape
    k = (x @ wk.T).reshape(B, T, num_heads, head_size).transpose(0, 2, 1, 3)
    q = (x @ wq.T).reshape(B, T, num_heads, head_size).transpose(0, 2, 1, 3)
    v = (x @ wv.T).reshape(B, T, num_heads, head_size).transpose(0, 2, 1, 3)
    wei = (q @ jnp.swapaxes(k, -2, -1)) * head_size ** (-0.5)
    tril = jnp.tril(jnp.ones((T, T), dtype=bool))
    wei = jnp.where(tril, wei, -jnp.inf)
    wei = jax.nn.softmax(wei, axis=-1)
    out = (wei @ v).transpose(0, 2, 1, 3).reshape(B, T, C)
    return out @ wp.T + bp


if __name__ == "__main__":
    C = N_EMBD

    key = jax.random.PRNGKey(0)
    kx, kk, kq, kv, kp, kb = jax.random.split(key, 6)

    # Deterministic "nn.Linear"-style init (uniform in [-1/sqrt(C), 1/sqrt(C)]).
    bound = 1.0 / (C ** 0.5)
    wk = jax.random.uniform(kk, (C, C), jnp.float32, -bound, bound)
    wq = jax.random.uniform(kq, (C, C), jnp.float32, -bound, bound)
    wv = jax.random.uniform(kv, (C, C), jnp.float32, -bound, bound)
    wp = jax.random.uniform(kp, (C, C), jnp.float32, -bound, bound)
    bp = jax.random.uniform(kb, (C,),   jnp.float32, -bound, bound)

    # Run 1: small aligned case (B=2, T=8), f32 I/O, single grid step.
    x1 = jax.random.normal(kx, (2, 8, C), dtype=jnp.float32)
    out1 = jax.block_until_ready(multi_head_attention(x1, wk, wq, wv, wp, bp))
    ref1 = _reference(x1, wk, wq, wv, wp, bp, NUM_HEADS, HEAD_SIZE)
    assert out1.shape == (2, 8, C)
    # Tolerance accounts for the EUP approximate reciprocal in the softmax.
    assert jnp.allclose(out1, ref1, atol=2e-3, rtol=2e-3), "mismatch vs JAX reference"

    # Run 2: full block_size sequence (T=27 -> padded to 32), batch not a
    # multiple of the lane group (B=9), and a >=2-step grid (both v7x TCs busy).
    x2 = jax.random.normal(jax.random.PRNGKey(1), (9, BLOCK_SIZE, C),
                           dtype=jnp.float32)
    out2 = jax.block_until_ready(multi_head_attention(x2, wk, wq, wv, wp, bp))
    ref2 = _reference(x2, wk, wq, wv, wp, bp, NUM_HEADS, HEAD_SIZE)
    assert out2.shape == (9, BLOCK_SIZE, C)
    assert jnp.allclose(out2, ref2, atol=2e-3, rtol=2e-3), "mismatch (padded case)"

    # Run 3: bf16 streaming path (halves x/out HBM traffic; f32 accumulation
    # and f32 softmax inside the kernel).  Looser tolerance for bf16 inputs.
    out3 = jax.block_until_ready(
        multi_head_attention(x2.astype(jnp.bfloat16), wk, wq, wv, wp, bp))
    assert out3.shape == (9, BLOCK_SIZE, C)
    assert jnp.allclose(out3.astype(jnp.float32), ref2, atol=5e-2, rtol=5e-2), \
        "mismatch (bf16 streaming case)"

    print("KERNEL_OK")
</pallas_src>

<mosaic_0001>
module attributes {stable_mosaic.version = 11 : i64} {
  func.func @_mha_kernel(%arg0: i32, %arg1: memref<8x128xf32, #tpu.memory_space<vmem>>, %arg2: memref<128x384xf32, #tpu.memory_space<vmem>>, %arg3: memref<128x128xf32, #tpu.memory_space<vmem>>, %arg4: memref<1x128xf32, #tpu.memory_space<vmem>>, %arg5: memref<8x8xf32, #tpu.memory_space<vmem>>, %arg6: memref<8x128xf32, #tpu.memory_space<vmem>>, %arg7: memref<8x128xf32, #tpu.memory_space<vmem>>) attributes {dimension_semantics = [#tpu.dimension_semantics<parallel>], iteration_bounds = array<i64: 1>, scalar_prefetch = 0 : i64, scratch_operands = 1 : i64, tpu.core_type = #tpu.core_type<tc>, window_params = [{transform_indices = @transform_0, window_bounds = array<i64: 8, 128>}, {pipeline_mode = #tpu.pipeline_mode<synchronous>, transform_indices = @transform_1, window_bounds = array<i64: 128, 384>}, {pipeline_mode = #tpu.pipeline_mode<synchronous>, transform_indices = @transform_2, window_bounds = array<i64: 128, 128>}, {pipeline_mode = #tpu.pipeline_mode<synchronous>, transform_indices = @transform_3, window_bounds = array<i64: 1, 128>}, {pipeline_mode = #tpu.pipeline_mode<synchronous>, transform_indices = @transform_4, window_bounds = array<i64: 8, 8>}, {transform_indices = @transform_5, window_bounds = array<i64: 8, 128>}]} {
    %c0 = arith.constant 0 : index
    %c0_0 = arith.constant 0 : index
    %0 = vector.load %arg1[%c0, %c0_0] : memref<8x128xf32, #tpu.memory_space<vmem>>, vector<8x128xf32>
    %c0_1 = arith.constant 0 : index
    %c0_2 = arith.constant 0 : index
    %1 = vector.load %arg2[%c0_1, %c0_2] : memref<128x384xf32, #tpu.memory_space<vmem>>, vector<128x384xf32>
    %cst = arith.constant dense<0.000000e+00> : vector<8x384xf32>
    %2 = tpu.matmul %0, %1, %cst {dimension_numbers = #tpu.dot_dimension_numbers<[1], [0], [0], [1], [0, 0, 1, 1], [], []>} : vector<8x128xf32>, vector<128x384xf32>, vector<8x384xf32> -> vector<8x384xf32>
    %3 = vector.extract_strided_slice %2 {offsets = [0, 0], sizes = [8, 128], strides = [1, 1]} : vector<8x384xf32> to vector<8x128xf32>
    %4 = vector.shape_cast %3 : vector<8x128xf32> to vector<1x8x128xf32>
    %5 = vector.extract_strided_slice %2 {offsets = [0, 128], sizes = [8, 128], strides = [1, 1]} : vector<8x384xf32> to vector<8x128xf32>
    %6 = vector.shape_cast %5 : vector<8x128xf32> to vector<1x8x128xf32>
    %7 = vector.extract_strided_slice %2 {offsets = [0, 256], sizes = [8, 128], strides = [1, 1]} : vector<8x384xf32> to vector<8x128xf32>
    %8 = vector.shape_cast %7 : vector<8x128xf32> to vector<1x8x128xf32>
    %c0_3 = arith.constant 0 : index
    %c0_4 = arith.constant 0 : index
    %9 = vector.load %arg5[%c0_3, %c0_4] : memref<8x8xf32, #tpu.memory_space<vmem>>, vector<8x8xf32>
    %10 = vector.shape_cast %9 : vector<8x8xf32> to vector<1x8x8xf32>
    %11 = vector.extract_strided_slice %4 {offsets = [0, 0, 0], sizes = [1, 8, 8], strides = [1, 1, 1]} : vector<1x8x128xf32> to vector<1x8x8xf32>
    %12 = vector.extract_strided_slice %6 {offsets = [0, 0, 0], sizes = [1, 8, 8], strides = [1, 1, 1]} : vector<1x8x128xf32> to vector<1x8x8xf32>
    %13 = vector.extract_strided_slice %8 {offsets = [0, 0, 0], sizes = [1, 8, 8], strides = [1, 1, 1]} : vector<1x8x128xf32> to vector<1x8x8xf32>
    "tpu.trace_start"() <{level = 10 : i32, message = "btd,bsd->bts"}> : () -> ()
    %cst_5 = arith.constant dense<0.000000e+00> : vector<1x8x8xf32>
    %14 = tpu.matmul %11, %12, %cst_5 {dimension_numbers = #tpu.dot_dimension_numbers<[2], [2], [1], [1], [0, 0, 0, 1, 1, 1], [0], [0]>} : vector<1x8x8xf32>, vector<1x8x8xf32>, vector<1x8x8xf32> -> vector<1x8x8xf32>
    "tpu.trace_stop"() : () -> ()
    %15 = arith.addf %14, %10 : vector<1x8x8xf32>
    %cst_6 = arith.constant dense<0xFF800000> : vector<1x8xf32>
    %16 = vector.multi_reduction <maximumf>, %15, %cst_6 [2] : vector<1x8x8xf32> to vector<1x8xf32>
    %17 = vector.shape_cast %16 : vector<1x8xf32> to vector<1x8x1xf32>
    %18 = vector.broadcast %17 : vector<1x8x1xf32> to vector<1x8x8xf32>
    %19 = arith.subf %15, %18 : vector<1x8x8xf32>
    %20 = math.exp %19 : vector<1x8x8xf32>
    %cst_7 = arith.constant dense<0.000000e+00> : vector<1x8xf32>
    %21 = vector.multi_reduction <add>, %20, %cst_7 [2] : vector<1x8x8xf32> to vector<1x8xf32>
    %22 = vector.shape_cast %21 : vector<1x8xf32> to vector<1x8x1xf32>
    %23 = tpu.reciprocal %22 {approx = true} : vector<1x8x1xf32> -> vector<1x8x1xf32>
    %24 = vector.broadcast %23 : vector<1x8x1xf32> to vector<1x8x8xf32>
    %25 = arith.mulf %20, %24 : vector<1x8x8xf32>
    "tpu.trace_start"() <{level = 10 : i32, message = "bts,bsd->btd"}> : () -> ()
    %cst_8 = arith.constant dense<0.000000e+00> : vector<1x8x8xf32>
    %26 = tpu.matmul %25, %13, %cst_8 {dimension_numbers = #tpu.dot_dimension_numbers<[2], [1], [1], [2], [0, 0, 0, 1, 1, 2], [0], [0]>} : vector<1x8x8xf32>, vector<1x8x8xf32>, vector<1x8x8xf32> -> vector<1x8x8xf32>
    "tpu.trace_stop"() : () -> ()
    %27 = vector.shape_cast %26 : vector<1x8x8xf32> to vector<8x8xf32>
    %c0_9 = arith.constant 0 : index
    %c0_10 = arith.constant 0 : index
    %28 = vector.load %arg7[%c0_9, %c0_10] : memref<8x128xf32, #tpu.memory_space<vmem>>, vector<8x8xf32>
    tpu.vector_store %arg7[%c0_9, %c0_10], %27 {strides = array<i32>} : memref<8x128xf32, #tpu.memory_space<vmem>>, vector<8x8xf32>,
    %29 = vector.extract_strided_slice %4 {offsets = [0, 0, 8], sizes = [1, 8, 8], strides = [1, 1, 1]} : vector<1x8x128xf32> to vector<1x8x8xf32>
    %30 = vector.extract_strided_slice %6 {offsets = [0, 0, 8], sizes = [1, 8, 8], strides = [1, 1, 1]} : vector<1x8x128xf32> to vector<1x8x8xf32>
    %31 = vector.extract_strided_slice %8 {offsets = [0, 0, 8], sizes = [1, 8, 8], strides = [1, 1, 1]} : vector<1x8x128xf32> to vector<1x8x8xf32>
    "tpu.trace_start"() <{level = 10 : i32, message = "btd,bsd->bts"}> : () -> ()
    %cst_11 = arith.constant dense<0.000000e+00> : vector<1x8x8xf32>
    %32 = tpu.matmul %29, %30, %cst_11 {dimension_numbers = #tpu.dot_dimension_numbers<[2], [2], [1], [1], [0, 0, 0, 1, 1, 1], [0], [0]>} : vector<1x8x8xf32>, vector<1x8x8xf32>, vector<1x8x8xf32> -> vector<1x8x8xf32>
    "tpu.trace_stop"() : () -> ()
    %33 = arith.addf %32, %10 : vector<1x8x8xf32>
    %cst_12 = arith.constant dense<0xFF800000> : vector<1x8xf32>
    %34 = vector.multi_reduction <maximumf>, %33, %cst_12 [2] : vector<1x8x8xf32> to vector<1x8xf32>
    %35 = vector.shape_cast %34 : vector<1x8xf32> to vector<1x8x1xf32>
    %36 = vector.broadcast %35 : vector<1x8x1xf32> to vector<1x8x8xf32>
    %37 = arith.subf %33, %36 : vector<1x8x8xf32>
    %38 = math.exp %37 : vector<1x8x8xf32>
    %cst_13 = arith.constant dense<0.000000e+00> : vector<1x8xf32>
    %39 = vector.multi_reduction <add>, %38, %cst_13 [2] : vector<1x8x8xf32> to vector<1x8xf32>
    %40 = vector.shape_cast %39 : vector<1x8xf32> to vector<1x8x1xf32>
    %41 = tpu.reciprocal %40 {approx = true} : vector<1x8x1xf32> -> vector<1x8x1xf32>
    %42 = vector.broadcast %41 : vector<1x8x1xf32> to vector<1x8x8xf32>
    %43 = arith.mulf %38, %42 : vector<1x8x8xf32>
    "tpu.trace_start"() <{level = 10 : i32, message = "bts,bsd->btd"}> : () -> ()
    %cst_14 = arith.constant dense<0.000000e+00> : vector<1x8x8xf32>
    %44 = tpu.matmul %43, %31, %cst_14 {dimension_numbers = #tpu.dot_dimension_numbers<[2], [1], [1], [2], [0, 0, 0, 1, 1, 2], [0], [0]>} : vector<1x8x8xf32>, vector<1x8x8xf32>, vector<1x8x8xf32> -> vector<1x8x8xf32>
    "tpu.trace_stop"() : () -> ()
    %45 = vector.shape_cast %44 : vector<1x8x8xf32> to vector<8x8xf32>
    %c0_15 = arith.constant 0 : index
    %c8 = arith.constant 8 : index
    %46 = vector.load %arg7[%c0_15, %c8] : memref<8x128xf32, #tpu.memory_space<vmem>>, vector<8x8xf32>
    tpu.vector_store %arg7[%c0_15, %c8], %45 {strides = array<i32>} : memref<8x128xf32, #tpu.memory_space<vmem>>, vector<8x8xf32>,
    %47 = vector.extract_strided_slice %4 {offsets = [0, 0, 16], sizes = [1, 8, 8], strides = [1, 1, 1]} : vector<1x8x128xf32> to vector<1x8x8xf32>
    %48 = vector.extract_strided_slice %6 {offsets = [0, 0, 16], sizes = [1, 8, 8], strides = [1, 1, 1]} : vector<1x8x128xf32> to vector<1x8x8xf32>
    %49 = vector.extract_strided_slice %8 {offsets = [0, 0, 16], sizes = [1, 8, 8], strides = [1, 1, 1]} : vector<1x8x128xf32> to vector<1x8x8xf32>
    "tpu.trace_start"() <{level = 10 : i32, message = "btd,bsd->bts"}> : () -> ()
    %cst_16 = arith.constant dense<0.000000e+00> : vector<1x8x8xf32>
    %50 = tpu.matmul %47, %48, %cst_16 {dimension_numbers = #tpu.dot_dimension_numbers<[2], [2], [1], [1], [0, 0, 0, 1, 1, 1], [0], [0]>} : vector<1x8x8xf32>, vector<1x8x8xf32>, vector<1x8x8xf32> -> vector<1x8x8xf32>
    "tpu.trace_stop"() : () -> ()
    %51 = arith.addf %50, %10 : vector<1x8x8xf32>
    %cst_17 = arith.constant dense<0xFF800000> : vector<1x8xf32>
    %52 = vector.multi_reduction <maximumf>, %51, %cst_17 [2] : vector<1x8x8xf32> to vector<1x8xf32>
    %53 = vector.shape_cast %52 : vector<1x8xf32> to vector<1x8x1xf32>
    %54 = vector.broadcast %53 : vector<1x8x1xf32> to vector<1x8x8xf32>
    %55 = arith.subf %51, %54 : vector<1x8x8xf32>
    %56 = math.exp %55 : vector<1x8x8xf32>
    %cst_18 = arith.constant dense<0.000000e+00> : vector<1x8xf32>
    %57 = vector.multi_reduction <add>, %56, %cst_18 [2] : vector<1x8x8xf32> to vector<1x8xf32>
    %58 = vector.shape_cast %57 : vector<1x8xf32> to vector<1x8x1xf32>
    %59 = tpu.reciprocal %58 {approx = true} : vector<1x8x1xf32> -> vector<1x8x1xf32>
    %60 = vector.broadcast %59 : vector<1x8x1xf32> to vector<1x8x8xf32>
    %61 = arith.mulf %56, %60 : vector<1x8x8xf32>
    "tpu.trace_start"() <{level = 10 : i32, message = "bts,bsd->btd"}> : () -> ()
    %cst_19 = arith.constant dense<0.000000e+00> : vector<1x8x8xf32>
    %62 = tpu.matmul %61, %49, %cst_19 {dimension_numbers = #tpu.dot_dimension_numbers<[2], [1], [1], [2], [0, 0, 0, 1, 1, 2], [0], [0]>} : vector<1x8x8xf32>, vector<1x8x8xf32>, vector<1x8x8xf32> -> vector<1x8x8xf32>
    "tpu.trace_stop"() : () -> ()
    %63 = vector.shape_cast %62 : vector<1x8x8xf32> to vector<8x8xf32>
    %c0_20 = arith.constant 0 : index
    %c16 = arith.constant 16 : index
    %64 = vector.load %arg7[%c0_20, %c16] : memref<8x128xf32, #tpu.memory_space<vmem>>, vector<8x8xf32>
    tpu.vector_store %arg7[%c0_20, %c16], %63 {strides = array<i32>} : memref<8x128xf32, #tpu.memory_space<vmem>>, vector<8x8xf32>,
    %65 = vector.extract_strided_slice %4 {offsets = [0, 0, 24], sizes = [1, 8, 8], strides = [1, 1, 1]} : vector<1x8x128xf32> to vector<1x8x8xf32>
    %66 = vector.extract_strided_slice %6 {offsets = [0, 0, 24], sizes = [1, 8, 8], strides = [1, 1, 1]} : vector<1x8x128xf32> to vector<1x8x8xf32>
    %67 = vector.extract_strided_slice %8 {offsets = [0, 0, 24], sizes = [1, 8, 8], strides = [1, 1, 1]} : vector<1x8x128xf32> to vector<1x8x8xf32>
    "tpu.trace_start"() <{level = 10 : i32, message = "btd,bsd->bts"}> : () -> ()
    %cst_21 = arith.constant dense<0.000000e+00> : vector<1x8x8xf32>
    %68 = tpu.matmul %65, %66, %cst_21 {dimension_numbers = #tpu.dot_dimension_numbers<[2], [2], [1], [1], [0, 0, 0, 1, 1, 1], [0], [0]>} : vector<1x8x8xf32>, vector<1x8x8xf32>, vector<1x8x8xf32> -> vector<1x8x8xf32>
    "tpu.trace_stop"() : () -> ()
    %69 = arith.addf %68, %10 : vector<1x8x8xf32>
    %cst_22 = arith.constant dense<0xFF800000> : vector<1x8xf32>
    %70 = vector.multi_reduction <maximumf>, %69, %cst_22 [2] : vector<1x8x8xf32> to vector<1x8xf32>
    %71 = vector.shape_cast %70 : vector<1x8xf32> to vector<1x8x1xf32>
    %72 = vector.broadcast %71 : vector<1x8x1xf32> to vector<1x8x8xf32>
    %73 = arith.subf %69, %72 : vector<1x8x8xf32>
    %74 = math.exp %73 : vector<1x8x8xf32>
    %cst_23 = arith.constant dense<0.000000e+00> : vector<1x8xf32>
    %75 = vector.multi_reduction <add>, %74, %cst_23 [2] : vector<1x8x8xf32> to vector<1x8xf32>
    %76 = vector.shape_cast %75 : vector<1x8xf32> to vector<1x8x1xf32>
    %77 = tpu.reciprocal %76 {approx = true} : vector<1x8x1xf32> -> vector<1x8x1xf32>
    %78 = vector.broadcast %77 : vector<1x8x1xf32> to vector<1x8x8xf32>
    %79 = arith.mulf %74, %78 : vector<1x8x8xf32>
    "tpu.trace_start"() <{level = 10 : i32, message = "bts,bsd->btd"}> : () -> ()
    %cst_24 = arith.constant dense<0.000000e+00> : vector<1x8x8xf32>
    %80 = tpu.matmul %79, %67, %cst_24 {dimension_numbers = #tpu.dot_dimension_numbers<[2], [1], [1], [2], [0, 0, 0, 1, 1, 2], [0], [0]>} : vector<1x8x8xf32>, vector<1x8x8xf32>, vector<1x8x8xf32> -> vector<1x8x8xf32>
    "tpu.trace_stop"() : () -> ()
    %81 = vector.shape_cast %80 : vector<1x8x8xf32> to vector<8x8xf32>
    %c0_25 = arith.constant 0 : index
    %c24 = arith.constant 24 : index
    %82 = vector.load %arg7[%c0_25, %c24] : memref<8x128xf32, #tpu.memory_space<vmem>>, vector<8x8xf32>
    tpu.vector_store %arg7[%c0_25, %c24], %81 {strides = array<i32>} : memref<8x128xf32, #tpu.memory_space<vmem>>, vector<8x8xf32>,
    %83 = vector.extract_strided_slice %4 {offsets = [0, 0, 32], sizes = [1, 8, 8], strides = [1, 1, 1]} : vector<1x8x128xf32> to vector<1x8x8xf32>
    %84 = vector.extract_strided_slice %6 {offsets = [0, 0, 32], sizes = [1, 8, 8], strides = [1, 1, 1]} : vector<1x8x128xf32> to vector<1x8x8xf32>
    %85 = vector.extract_strided_slice %8 {offsets = [0, 0, 32], sizes = [1, 8, 8], strides = [1, 1, 1]} : vector<1x8x128xf32> to vector<1x8x8xf32>
    "tpu.trace_start"() <{level = 10 : i32, message = "btd,bsd->bts"}> : () -> ()
    %cst_26 = arith.constant dense<0.000000e+00> : vector<1x8x8xf32>
    %86 = tpu.matmul %83, %84, %cst_26 {dimension_numbers = #tpu.dot_dimension_numbers<[2], [2], [1], [1], [0, 0, 0, 1, 1, 1], [0], [0]>} : vector<1x8x8xf32>, vector<1x8x8xf32>, vector<1x8x8xf32> -> vector<1x8x8xf32>
    "tpu.trace_stop"() : () -> ()
    %87 = arith.addf %86, %10 : vector<1x8x8xf32>
    %cst_27 = arith.constant dense<0xFF800000> : vector<1x8xf32>
    %88 = vector.multi_reduction <maximumf>, %87, %cst_27 [2] : vector<1x8x8xf32> to vector<1x8xf32>
    %89 = vector.shape_cast %88 : vector<1x8xf32> to vector<1x8x1xf32>
    %90 = vector.broadcast %89 : vector<1x8x1xf32> to vector<1x8x8xf32>
    %91 = arith.subf %87, %90 : vector<1x8x8xf32>
    %92 = math.exp %91 : vector<1x8x8xf32>
    %cst_28 = arith.constant dense<0.000000e+00> : vector<1x8xf32>
    %93 = vector.multi_reduction <add>, %92, %cst_28 [2] : vector<1x8x8xf32> to vector<1x8xf32>
    %94 = vector.shape_cast %93 : vector<1x8xf32> to vector<1x8x1xf32>
    %95 = tpu.reciprocal %94 {approx = true} : vector<1x8x1xf32> -> vector<1x8x1xf32>
    %96 = vector.broadcast %95 : vector<1x8x1xf32> to vector<1x8x8xf32>
    %97 = arith.mulf %92, %96 : vector<1x8x8xf32>
    "tpu.trace_start"() <{level = 10 : i32, message = "bts,bsd->btd"}> : () -> ()
    %cst_29 = arith.constant dense<0.000000e+00> : vector<1x8x8xf32>
    %98 = tpu.matmul %97, %85, %cst_29 {dimension_numbers = #tpu.dot_dimension_numbers<[2], [1], [1], [2], [0, 0, 0, 1, 1, 2], [0], [0]>} : vector<1x8x8xf32>, vector<1x8x8xf32>, vector<1x8x8xf32> -> vector<1x8x8xf32>
    "tpu.trace_stop"() : () -> ()
    %99 = vector.shape_cast %98 : vector<1x8x8xf32> to vector<8x8xf32>
    %c0_30 = arith.constant 0 : index
    %c32 = arith.constant 32 : index
    %100 = vector.load %arg7[%c0_30, %c32] : memref<8x128xf32, #tpu.memory_space<vmem>>, vector<8x8xf32>
    tpu.vector_store %arg7[%c0_30, %c32], %99 {strides = array<i32>} : memref<8x128xf32, #tpu.memory_space<vmem>>, vector<8x8xf32>,
    %101 = vector.extract_strided_slice %4 {offsets = [0, 0, 40], sizes = [1, 8, 8], strides = [1, 1, 1]} : vector<1x8x128xf32> to vector<1x8x8xf32>
    %102 = vector.extract_strided_slice %6 {offsets = [0, 0, 40], sizes = [1, 8, 8], strides = [1, 1, 1]} : vector<1x8x128xf32> to vector<1x8x8xf32>
    %103 = vector.extract_strided_slice %8 {offsets = [0, 0, 40], sizes = [1, 8, 8], strides = [1, 1, 1]} : vector<1x8x128xf32> to vector<1x8x8xf32>
    "tpu.trace_start"() <{level = 10 : i32, message = "btd,bsd->bts"}> : () -> ()
    %cst_31 = arith.constant dense<0.000000e+00> : vector<1x8x8xf32>
    %104 = tpu.matmul %101, %102, %cst_31 {dimension_numbers = #tpu.dot_dimension_numbers<[2], [2], [1], [1], [0, 0, 0, 1, 1, 1], [0], [0]>} : vector<1x8x8xf32>, vector<1x8x8xf32>, vector<1x8x8xf32> -> vector<1x8x8xf32>
    "tpu.trace_stop"() : () -> ()
    %105 = arith.addf %104, %10 : vector<1x8x8xf32>
    %cst_32 = arith.constant dense<0xFF800000> : vector<1x8xf32>
    %106 = vector.multi_reduction <maximumf>, %105, %cst_32 [2] : vector<1x8x8xf32> to vector<1x8xf32>
    %107 = vector.shape_cast %106 : vector<1x8xf32> to vector<1x8x1xf32>
    %108 = vector.broadcast %107 : vector<1x8x1xf32> to vector<1x8x8xf32>
    %109 = arith.subf %105, %108 : vector<1x8x8xf32>
    %110 = math.exp %109 : vector<1x8x8xf32>
    %cst_33 = arith.constant dense<0.000000e+00> : vector<1x8xf32>
    %111 = vector.multi_reduction <add>, %110, %cst_33 [2] : vector<1x8x8xf32> to vector<1x8xf32>
    %112 = vector.shape_cast %111 : vector<1x8xf32> to vector<1x8x1xf32>
    %113 = tpu.reciprocal %112 {approx = true} : vector<1x8x1xf32> -> vector<1x8x1xf32>
    %114 = vector.broadcast %113 : vector<1x8x1xf32> to vector<1x8x8xf32>
    %115 = arith.mulf %110, %114 : vector<1x8x8xf32>
    "tpu.trace_start"() <{level = 10 : i32, message = "bts,bsd->btd"}> : () -> ()
    %cst_34 = arith.constant dense<0.000000e+00> : vector<1x8x8xf32>
    %116 = tpu.matmul %115, %103, %cst_34 {dimension_numbers = #tpu.dot_dimension_numbers<[2], [1], [1], [2], [0, 0, 0, 1, 1, 2], [0], [0]>} : vector<1x8x8xf32>, vector<1x8x8xf32>, vector<1x8x8xf32> -> vector<1x8x8xf32>
    "tpu.trace_stop"() : () -> ()
    %117 = vector.shape_cast %116 : vector<1x8x8xf32> to vector<8x8xf32>
    %c0_35 = arith.constant 0 : index
    %c40 = arith.constant 40 : index
    %118 = vector.load %arg7[%c0_35, %c40] : memref<8x128xf32, #tpu.memory_space<vmem>>, vector<8x8xf32>
    tpu.vector_store %arg7[%c0_35, %c40], %117 {strides = array<i32>} : memref<8x128xf32, #tpu.memory_space<vmem>>, vector<8x8xf32>,
    %119 = vector.extract_strided_slice %4 {offsets = [0, 0, 48], sizes = [1, 8, 8], strides = [1, 1, 1]} : vector<1x8x128xf32> to vector<1x8x8xf32>
    %120 = vector.extract_strided_slice %6 {offsets = [0, 0, 48], sizes = [1, 8, 8], strides = [1, 1, 1]} : vector<1x8x128xf32> to vector<1x8x8xf32>
    %121 = vector.extract_strided_slice %8 {offsets = [0, 0, 48], sizes = [1, 8, 8], strides = [1, 1, 1]} : vector<1x8x128xf32> to vector<1x8x8xf32>
    "tpu.trace_start"() <{level = 10 : i32, message = "btd,bsd->bts"}> : () -> ()
    %cst_36 = arith.constant dense<0.000000e+00> : vector<1x8x8xf32>
    %122 = tpu.matmul %119, %120, %cst_36 {dimension_numbers = #tpu.dot_dimension_numbers<[2], [2], [1], [1], [0, 0, 0, 1, 1, 1], [0], [0]>} : vector<1x8x8xf32>, vector<1x8x8xf32>, vector<1x8x8xf32> -> vector<1x8x8xf32>
    "tpu.trace_stop"() : () -> ()
    %123 = arith.addf %122, %10 : vector<1x8x8xf32>
    %cst_37 = arith.constant dense<0xFF800000> : vector<1x8xf32>
    %124 = vector.multi_reduction <maximumf>, %123, %cst_37 [2] : vector<1x8x8xf32> to vector<1x8xf32>
    %125 = vector.shape_cast %124 : vector<1x8xf32> to vector<1x8x1xf32>
    %126 = vector.broadcast %125 : vector<1x8x1xf32> to vector<1x8x8xf32>
    %127 = arith.subf %123, %126 : vector<1x8x8xf32>
    %128 = math.exp %127 : vector<1x8x8xf32>
    %cst_38 = arith.constant dense<0.000000e+00> : vector<1x8xf32>
    %129 = vector.multi_reduction <add>, %128, %cst_38 [2] : vector<1x8x8xf32> to vector<1x8xf32>
    %130 = vector.shape_cast %129 : vector<1x8xf32> to vector<1x8x1xf32>
    %131 = tpu.reciprocal %130 {approx = true} : vector<1x8x1xf32> -> vector<1x8x1xf32>
    %132 = vector.broadcast %131 : vector<1x8x1xf32> to vector<1x8x8xf32>
    %133 = arith.mulf %128, %132 : vector<1x8x8xf32>
    "tpu.trace_start"() <{level = 10 : i32, message = "bts,bsd->btd"}> : () -> ()
    %cst_39 = arith.constant dense<0.000000e+00> : vector<1x8x8xf32>
    %134 = tpu.matmul %133, %121, %cst_39 {dimension_numbers = #tpu.dot_dimension_numbers<[2], [1], [1], [2], [0, 0, 0, 1, 1, 2], [0], [0]>} : vector<1x8x8xf32>, vector<1x8x8xf32>, vector<1x8x8xf32> -> vector<1x8x8xf32>
    "tpu.trace_stop"() : () -> ()
    %135 = vector.shape_cast %134 : vector<1x8x8xf32> to vector<8x8xf32>
    %c0_40 = arith.constant 0 : index
    %c48 = arith.constant 48 : index
    %136 = vector.load %arg7[%c0_40, %c48] : memref<8x128xf32, #tpu.memory_space<vmem>>, vector<8x8xf32>
    tpu.vector_store %arg7[%c0_40, %c48], %135 {strides = array<i32>} : memref<8x128xf32, #tpu.memory_space<vmem>>, vector<8x8xf32>,
    %137 = vector.extract_strided_slice %4 {offsets = [0, 0, 56], sizes = [1, 8, 8], strides = [1, 1, 1]} : vector<1x8x128xf32> to vector<1x8x8xf32>
    %138 = vector.extract_strided_slice %6 {offsets = [0, 0, 56], sizes = [1, 8, 8], strides = [1, 1, 1]} : vector<1x8x128xf32> to vector<1x8x8xf32>
    %139 = vector.extract_strided_slice %8 {offsets = [0, 0, 56], sizes = [1, 8, 8], strides = [1, 1, 1]} : vector<1x8x128xf32> to vector<1x8x8xf32>
    "tpu.trace_start"() <{level = 10 : i32, message = "btd,bsd->bts"}> : () -> ()
    %cst_41 = arith.constant dense<0.000000e+00> : vector<1x8x8xf32>
    %140 = tpu.matmul %137, %138, %cst_41 {dimension_numbers = #tpu.dot_dimension_numbers<[2], [2], [1], [1], [0, 0, 0, 1, 1, 1], [0], [0]>} : vector<1x8x8xf32>, vector<1x8x8xf32>, vector<1x8x8xf32> -> vector<1x8x8xf32>
    "tpu.trace_stop"() : () -> ()
    %141 = arith.addf %140, %10 : vector<1x8x8xf32>
    %cst_42 = arith.constant dense<0xFF800000> : vector<1x8xf32>
    %142 = vector.multi_reduction <maximumf>, %141, %cst_42 [2] : vector<1x8x8xf32> to vector<1x8xf32>
    %143 = vector.shape_cast %142 : vector<1x8xf32> to vector<1x8x1xf32>
    %144 = vector.broadcast %143 : vector<1x8x1xf32> to vector<1x8x8xf32>
    %145 = arith.subf %141, %144 : vector<1x8x8xf32>
    %146 = math.exp %145 : vector<1x8x8xf32>
    %cst_43 = arith.constant dense<0.000000e+00> : vector<1x8xf32>
    %147 = vector.multi_reduction <add>, %146, %cst_43 [2] : vector<1x8x8xf32> to vector<1x8xf32>
    %148 = vector.shape_cast %147 : vector<1x8xf32> to vector<1x8x1xf32>
    %149 = tpu.reciprocal %148 {approx = true} : vector<1x8x1xf32> -> vector<1x8x1xf32>
    %150 = vector.broadcast %149 : vector<1x8x1xf32> to vector<1x8x8xf32>
    %151 = arith.mulf %146, %150 : vector<1x8x8xf32>
    "tpu.trace_start"() <{level = 10 : i32, message = "bts,bsd->btd"}> : () -> ()
    %cst_44 = arith.constant dense<0.000000e+00> : vector<1x8x8xf32>
    %152 = tpu.matmul %151, %139, %cst_44 {dimension_numbers = #tpu.dot_dimension_numbers<[2], [1], [1], [2], [0, 0, 0, 1, 1, 2], [0], [0]>} : vector<1x8x8xf32>, vector<1x8x8xf32>, vector<1x8x8xf32> -> vector<1x8x8xf32>
    "tpu.trace_stop"() : () -> ()
    %153 = vector.shape_cast %152 : vector<1x8x8xf32> to vector<8x8xf32>
    %c0_45 = arith.constant 0 : index
    %c56 = arith.constant 56 : index
    %154 = vector.load %arg7[%c0_45, %c56] : memref<8x128xf32, #tpu.memory_space<vmem>>, vector<8x8xf32>
    tpu.vector_store %arg7[%c0_45, %c56], %153 {strides = array<i32>} : memref<8x128xf32, #tpu.memory_space<vmem>>, vector<8x8xf32>,
    %155 = vector.extract_strided_slice %4 {offsets = [0, 0, 64], sizes = [1, 8, 8], strides = [1, 1, 1]} : vector<1x8x128xf32> to vector<1x8x8xf32>
    %156 = vector.extract_strided_slice %6 {offsets = [0, 0, 64], sizes = [1, 8, 8], strides = [1, 1, 1]} : vector<1x8x128xf32> to vector<1x8x8xf32>
    %157 = vector.extract_strided_slice %8 {offsets = [0, 0, 64], sizes = [1, 8, 8], strides = [1, 1, 1]} : vector<1x8x128xf32> to vector<1x8x8xf32>
    "tpu.trace_start"() <{level = 10 : i32, message = "btd,bsd->bts"}> : () -> ()
    %cst_46 = arith.constant dense<0.000000e+00> : vector<1x8x8xf32>
    %158 = tpu.matmul %155, %156, %cst_46 {dimension_numbers = #tpu.dot_dimension_numbers<[2], [2], [1], [1], [0, 0, 0, 1, 1, 1], [0], [0]>} : vector<1x8x8xf32>, vector<1x8x8xf32>, vector<1x8x8xf32> -> vector<1x8x8xf32>
    "tpu.trace_stop"() : () -> ()
    %159 = arith.addf %158, %10 : vector<1x8x8xf32>
    %cst_47 = arith.constant dense<0xFF800000> : vector<1x8xf32>
    %160 = vector.multi_reduction <maximumf>, %159, %cst_47 [2] : vector<1x8x8xf32> to vector<1x8xf32>
    %161 = vector.shape_cast %160 : vector<1x8xf32> to vector<1x8x1xf32>
    %162 = vector.broadcast %161 : vector<1x8x1xf32> to vector<1x8x8xf32>
    %163 = arith.subf %159, %162 : vector<1x8x8xf32>
    %164 = math.exp %163 : vector<1x8x8xf32>
    %cst_48 = arith.constant dense<0.000000e+00> : vector<1x8xf32>
    %165 = vector.multi_reduction <add>, %164, %cst_48 [2] : vector<1x8x8xf32> to vector<1x8xf32>
    %166 = vector.shape_cast %165 : vector<1x8xf32> to vector<1x8x1xf32>
    %167 = tpu.reciprocal %166 {approx = true} : vector<1x8x1xf32> -> vector<1x8x1xf32>
    %168 = vector.broadcast %167 : vector<1x8x1xf32> to vector<1x8x8xf32>
    %169 = arith.mulf %164, %168 : vector<1x8x8xf32>
    "tpu.trace_start"() <{level = 10 : i32, message = "bts,bsd->btd"}> : () -> ()
    %cst_49 = arith.constant dense<0.000000e+00> : vector<1x8x8xf32>
    %170 = tpu.matmul %169, %157, %cst_49 {dimension_numbers = #tpu.dot_dimension_numbers<[2], [1], [1], [2], [0, 0, 0, 1, 1, 2], [0], [0]>} : vector<1x8x8xf32>, vector<1x8x8xf32>, vector<1x8x8xf32> -> vector<1x8x8xf32>
    "tpu.trace_stop"() : () -> ()
    %171 = vector.shape_cast %170 : vector<1x8x8xf32> to vector<8x8xf32>
    %c0_50 = arith.constant 0 : index
    %c64 = arith.constant 64 : index
    %172 = vector.load %arg7[%c0_50, %c64] : memref<8x128xf32, #tpu.memory_space<vmem>>, vector<8x8xf32>
    tpu.vector_store %arg7[%c0_50, %c64], %171 {strides = array<i32>} : memref<8x128xf32, #tpu.memory_space<vmem>>, vector<8x8xf32>,
    %173 = vector.extract_strided_slice %4 {offsets = [0, 0, 72], sizes = [1, 8, 8], strides = [1, 1, 1]} : vector<1x8x128xf32> to vector<1x8x8xf32>
    %174 = vector.extract_strided_slice %6 {offsets = [0, 0, 72], sizes = [1, 8, 8], strides = [1, 1, 1]} : vector<1x8x128xf32> to vector<1x8x8xf32>
    %175 = vector.extract_strided_slice %8 {offsets = [0, 0, 72], sizes = [1, 8, 8], strides = [1, 1, 1]} : vector<1x8x128xf32> to vector<1x8x8xf32>
    "tpu.trace_start"() <{level = 10 : i32, message = "btd,bsd->bts"}> : () -> ()
    %cst_51 = arith.constant dense<0.000000e+00> : vector<1x8x8xf32>
    %176 = tpu.matmul %173, %174, %cst_51 {dimension_numbers = #tpu.dot_dimension_numbers<[2], [2], [1], [1], [0, 0, 0, 1, 1, 1], [0], [0]>} : vector<1x8x8xf32>, vector<1x8x8xf32>, vector<1x8x8xf32> -> vector<1x8x8xf32>
    "tpu.trace_stop"() : () -> ()
    %177 = arith.addf %176, %10 : vector<1x8x8xf32>
    %cst_52 = arith.constant dense<0xFF800000> : vector<1x8xf32>
    %178 = vector.multi_reduction <maximumf>, %177, %cst_52 [2] : vector<1x8x8xf32> to vector<1x8xf32>
    %179 = vector.shape_cast %178 : vector<1x8xf32> to vector<1x8x1xf32>
    %180 = vector.broadcast %179 : vector<1x8x1xf32> to vector<1x8x8xf32>
    %181 = arith.subf %177, %180 : vector<1x8x8xf32>
    %182 = math.exp %181 : vector<1x8x8xf32>
    %cst_53 = arith.constant dense<0.000000e+00> : vector<1x8xf32>
    %183 = vector.multi_reduction <add>, %182, %cst_53 [2] : vector<1x8x8xf32> to vector<1x8xf32>
    %184 = vector.shape_cast %183 : vector<1x8xf32> to vector<1x8x1xf32>
    %185 = tpu.reciprocal %184 {approx = true} : vector<1x8x1xf32> -> vector<1x8x1xf32>
    %186 = vector.broadcast %185 : vector<1x8x1xf32> to vector<1x8x8xf32>
    %187 = arith.mulf %182, %186 : vector<1x8x8xf32>
    "tpu.trace_start"() <{level = 10 : i32, message = "bts,bsd->btd"}> : () -> ()
    %cst_54 = arith.constant dense<0.000000e+00> : vector<1x8x8xf32>
    %188 = tpu.matmul %187, %175, %cst_54 {dimension_numbers = #tpu.dot_dimension_numbers<[2], [1], [1], [2], [0, 0, 0, 1, 1, 2], [0], [0]>} : vector<1x8x8xf32>, vector<1x8x8xf32>, vector<1x8x8xf32> -> vector<1x8x8xf32>
    "tpu.trace_stop"() : () -> ()
    %189 = vector.shape_cast %188 : vector<1x8x8xf32> to vector<8x8xf32>
    %c0_55 = arith.constant 0 : index
    %c72 = arith.constant 72 : index
    %190 = vector.load %arg7[%c0_55, %c72] : memref<8x128xf32, #tpu.memory_space<vmem>>, vector<8x8xf32>
    tpu.vector_store %arg7[%c0_55, %c72], %189 {strides = array<i32>} : memref<8x128xf32, #tpu.memory_space<vmem>>, vector<8x8xf32>,
    %191 = vector.extract_strided_slice %4 {offsets = [0, 0, 80], sizes = [1, 8, 8], strides = [1, 1, 1]} : vector<1x8x128xf32> to vector<1x8x8xf32>
    %192 = vector.extract_strided_slice %6 {offsets = [0, 0, 80], sizes = [1, 8, 8], strides = [1, 1, 1]} : vector<1x8x128xf32> to vector<1x8x8xf32>
    %193 = vector.extract_strided_slice %8 {offsets = [0, 0, 80], sizes = [1, 8, 8], strides = [1, 1, 1]} : vector<1x8x128xf32> to vector<1x8x8xf32>
    "tpu.trace_start"() <{level = 10 : i32, message = "btd,bsd->bts"}> : () -> ()
    %cst_56 = arith.constant dense<0.000000e+00> : vector<1x8x8xf32>
    %194 = tpu.matmul %191, %192, %cst_56 {dimension_numbers = #tpu.dot_dimension_numbers<[2], [2], [1], [1], [0, 0, 0, 1, 1, 1], [0], [0]>} : vector<1x8x8xf32>, vector<1x8x8xf32>, vector<1x8x8xf32> -> vector<1x8x8xf32>
    "tpu.trace_stop"() : () -> ()
    %195 = arith.addf %194, %10 : vector<1x8x8xf32>
    %cst_57 = arith.constant dense<0xFF800000> : vector<1x8xf32>
    %196 = vector.multi_reduction <maximumf>, %195, %cst_57 [2] : vector<1x8x8xf32> to vector<1x8xf32>
    %197 = vector.shape_cast %196 : vector<1x8xf32> to vector<1x8x1xf32>
    %198 = vector.broadcast %197 : vector<1x8x1xf32> to vector<1x8x8xf32>
    %199 = arith.subf %195, %198 : vector<1x8x8xf32>
    %200 = math.exp %199 : vector<1x8x8xf32>
    %cst_58 = arith.constant dense<0.000000e+00> : vector<1x8xf32>
    %201 = vector.multi_reduction <add>, %200, %cst_58 [2] : vector<1x8x8xf32> to vector<1x8xf32>
    %202 = vector.shape_cast %201 : vector<1x8xf32> to vector<1x8x1xf32>
    %203 = tpu.reciprocal %202 {approx = true} : vector<1x8x1xf32> -> vector<1x8x1xf32>
    %204 = vector.broadcast %203 : vector<1x8x1xf32> to vector<1x8x8xf32>
    %205 = arith.mulf %200, %204 : vector<1x8x8xf32>
    "tpu.trace_start"() <{level = 10 : i32, message = "bts,bsd->btd"}> : () -> ()
    %cst_59 = arith.constant dense<0.000000e+00> : vector<1x8x8xf32>
    %206 = tpu.matmul %205, %193, %cst_59 {dimension_numbers = #tpu.dot_dimension_numbers<[2], [1], [1], [2], [0, 0, 0, 1, 1, 2], [0], [0]>} : vector<1x8x8xf32>, vector<1x8x8xf32>, vector<1x8x8xf32> -> vector<1x8x8xf32>
    "tpu.trace_stop"() : () -> ()
    %207 = vector.shape_cast %206 : vector<1x8x8xf32> to vector<8x8xf32>
    %c0_60 = arith.constant 0 : index
    %c80 = arith.constant 80 : index
    %208 = vector.load %arg7[%c0_60, %c80] : memref<8x128xf32, #tpu.memory_space<vmem>>, vector<8x8xf32>
    tpu.vector_store %arg7[%c0_60, %c80], %207 {strides = array<i32>} : memref<8x128xf32, #tpu.memory_space<vmem>>, vector<8x8xf32>,
    %209 = vector.extract_strided_slice %4 {offsets = [0, 0, 88], sizes = [1, 8, 8], strides = [1, 1, 1]} : vector<1x8x128xf32> to vector<1x8x8xf32>
    %210 = vector.extract_strided_slice %6 {offsets = [0, 0, 88], sizes = [1, 8, 8], strides = [1, 1, 1]} : vector<1x8x128xf32> to vector<1x8x8xf32>
    %211 = vector.extract_strided_slice %8 {offsets = [0, 0, 88], sizes = [1, 8, 8], strides = [1, 1, 1]} : vector<1x8x128xf32> to vector<1x8x8xf32>
    "tpu.trace_start"() <{level = 10 : i32, message = "btd,bsd->bts"}> : () -> ()
    %cst_61 = arith.constant dense<0.000000e+00> : vector<1x8x8xf32>
    %212 = tpu.matmul %209, %210, %cst_61 {dimension_numbers = #tpu.dot_dimension_numbers<[2], [2], [1], [1], [0, 0, 0, 1, 1, 1], [0], [0]>} : vector<1x8x8xf32>, vector<1x8x8xf32>, vector<1x8x8xf32> -> vector<1x8x8xf32>
    "tpu.trace_stop"() : () -> ()
    %213 = arith.addf %212, %10 : vector<1x8x8xf32>
    %cst_62 = arith.constant dense<0xFF800000> : vector<1x8xf32>
    %214 = vector.multi_reduction <maximumf>, %213, %cst_62 [2] : vector<1x8x8xf32> to vector<1x8xf32>
    %215 = vector.shape_cast %214 : vector<1x8xf32> to vector<1x8x1xf32>
    %216 = vector.broadcast %215 : vector<1x8x1xf32> to vector<1x8x8xf32>
    %217 = arith.subf %213, %216 : vector<1x8x8xf32>
    %218 = math.exp %217 : vector<1x8x8xf32>
    %cst_63 = arith.constant dense<0.000000e+00> : vector<1x8xf32>
    %219 = vector.multi_reduction <add>, %218, %cst_63 [2] : vector<1x8x8xf32> to vector<1x8xf32>
    %220 = vector.shape_cast %219 : vector<1x8xf32> to vector<1x8x1xf32>
    %221 = tpu.reciprocal %220 {approx = true} : vector<1x8x1xf32> -> vector<1x8x1xf32>
    %222 = vector.broadcast %221 : vector<1x8x1xf32> to vector<1x8x8xf32>
    %223 = arith.mulf %218, %222 : vector<1x8x8xf32>
    "tpu.trace_start"() <{level = 10 : i32, message = "bts,bsd->btd"}> : () -> ()
    %cst_64 = arith.constant dense<0.000000e+00> : vector<1x8x8xf32>
    %224 = tpu.matmul %223, %211, %cst_64 {dimension_numbers = #tpu.dot_dimension_numbers<[2], [1], [1], [2], [0, 0, 0, 1, 1, 2], [0], [0]>} : vector<1x8x8xf32>, vector<1x8x8xf32>, vector<1x8x8xf32> -> vector<1x8x8xf32>
    "tpu.trace_stop"() : () -> ()
    %225 = vector.shape_cast %224 : vector<1x8x8xf32> to vector<8x8xf32>
    %c0_65 = arith.constant 0 : index
    %c88 = arith.constant 88 : index
    %226 = vector.load %arg7[%c0_65, %c88] : memref<8x128xf32, #tpu.memory_space<vmem>>, vector<8x8xf32>
    tpu.vector_store %arg7[%c0_65, %c88], %225 {strides = array<i32>} : memref<8x128xf32, #tpu.memory_space<vmem>>, vector<8x8xf32>,
    %227 = vector.extract_strided_slice %4 {offsets = [0, 0, 96], sizes = [1, 8, 8], strides = [1, 1, 1]} : vector<1x8x128xf32> to vector<1x8x8xf32>
    %228 = vector.extract_strided_slice %6 {offsets = [0, 0, 96], sizes = [1, 8, 8], strides = [1, 1, 1]} : vector<1x8x128xf32> to vector<1x8x8xf32>
    %229 = vector.extract_strided_slice %8 {offsets = [0, 0, 96], sizes = [1, 8, 8], strides = [1, 1, 1]} : vector<1x8x128xf32> to vector<1x8x8xf32>
    "tpu.trace_start"() <{level = 10 : i32, message = "btd,bsd->bts"}> : () -> ()
    %cst_66 = arith.constant dense<0.000000e+00> : vector<1x8x8xf32>
    %230 = tpu.matmul %227, %228, %cst_66 {dimension_numbers = #tpu.dot_dimension_numbers<[2], [2], [1], [1], [0, 0, 0, 1, 1, 1], [0], [0]>} : vector<1x8x8xf32>, vector<1x8x8xf32>, vector<1x8x8xf32> -> vector<1x8x8xf32>
    "tpu.trace_stop"() : () -> ()
    %231 = arith.addf %230, %10 : vector<1x8x8xf32>
    %cst_67 = arith.constant dense<0xFF800000> : vector<1x8xf32>
    %232 = vector.multi_reduction <maximumf>, %231, %cst_67 [2] : vector<1x8x8xf32> to vector<1x8xf32>
    %233 = vector.shape_cast %232 : vector<1x8xf32> to vector<1x8x1xf32>
    %234 = vector.broadcast %233 : vector<1x8x1xf32> to vector<1x8x8xf32>
    %235 = arith.subf %231, %234 : vector<1x8x8xf32>
    %236 = math.exp %235 : vector<1x8x8xf32>
    %cst_68 = arith.constant dense<0.000000e+00> : vector<1x8xf32>
    %237 = vector.multi_reduction <add>, %236, %cst_68 [2] : vector<1x8x8xf32> to vector<1x8xf32>
    %238 = vector.shape_cast %237 : vector<1x8xf32> to vector<1x8x1xf32>
    %239 = tpu.reciprocal %238 {approx = true} : vector<1x8x1xf32> -> vector<1x8x1xf32>
    %240 = vector.broadcast %239 : vector<1x8x1xf32> to vector<1x8x8xf32>
    %241 = arith.mulf %236, %240 : vector<1x8x8xf32>
    "tpu.trace_start"() <{level = 10 : i32, message = "bts,bsd->btd"}> : () -> ()
    %cst_69 = arith.constant dense<0.000000e+00> : vector<1x8x8xf32>
    %242 = tpu.matmul %241, %229, %cst_69 {dimension_numbers = #tpu.dot_dimension_numbers<[2], [1], [1], [2], [0, 0, 0, 1, 1, 2], [0], [0]>} : vector<1x8x8xf32>, vector<1x8x8xf32>, vector<1x8x8xf32> -> vector<1x8x8xf32>
    "tpu.trace_stop"() : () -> ()
    %243 = vector.shape_cast %242 : vector<1x8x8xf32> to vector<8x8xf32>
    %c0_70 = arith.constant 0 : index
    %c96 = arith.constant 96 : index
    %244 = vector.load %arg7[%c0_70, %c96] : memref<8x128xf32, #tpu.memory_space<vmem>>, vector<8x8xf32>
    tpu.vector_store %arg7[%c0_70, %c96], %243 {strides = array<i32>} : memref<8x128xf32, #tpu.memory_space<vmem>>, vector<8x8xf32>,
    %245 = vector.extract_strided_slice %4 {offsets = [0, 0, 104], sizes = [1, 8, 8], strides = [1, 1, 1]} : vector<1x8x128xf32> to vector<1x8x8xf32>
    %246 = vector.extract_strided_slice %6 {offsets = [0, 0, 104], sizes = [1, 8, 8], strides = [1, 1, 1]} : vector<1x8x128xf32> to vector<1x8x8xf32>
    %247 = vector.extract_strided_slice %8 {offsets = [0, 0, 104], sizes = [1, 8, 8], strides = [1, 1, 1]} : vector<1x8x128xf32> to vector<1x8x8xf32>
    "tpu.trace_start"() <{level = 10 : i32, message = "btd,bsd->bts"}> : () -> ()
    %cst_71 = arith.constant dense<0.000000e+00> : vector<1x8x8xf32>
    %248 = tpu.matmul %245, %246, %cst_71 {dimension_numbers = #tpu.dot_dimension_numbers<[2], [2], [1], [1], [0, 0, 0, 1, 1, 1], [0], [0]>} : vector<1x8x8xf32>, vector<1x8x8xf32>, vector<1x8x8xf32> -> vector<1x8x8xf32>
    "tpu.trace_stop"() : () -> ()
    %249 = arith.addf %248, %10 : vector<1x8x8xf32>
    %cst_72 = arith.constant dense<0xFF800000> : vector<1x8xf32>
    %250 = vector.multi_reduction <maximumf>, %249, %cst_72 [2] : vector<1x8x8xf32> to vector<1x8xf32>
    %251 = vector.shape_cast %250 : vector<1x8xf32> to vector<1x8x1xf32>
    %252 = vector.broadcast %251 : vector<1x8x1xf32> to vector<1x8x8xf32>
    %253 = arith.subf %249, %252 : vector<1x8x8xf32>
    %254 = math.exp %253 : vector<1x8x8xf32>
    %cst_73 = arith.constant dense<0.000000e+00> : vector<1x8xf32>
    %255 = vector.multi_reduction <add>, %254, %cst_73 [2] : vector<1x8x8xf32> to vector<1x8xf32>
    %256 = vector.shape_cast %255 : vector<1x8xf32> to vector<1x8x1xf32>
    %257 = tpu.reciprocal %256 {approx = true} : vector<1x8x1xf32> -> vector<1x8x1xf32>
    %258 = vector.broadcast %257 : vector<1x8x1xf32> to vector<1x8x8xf32>
    %259 = arith.mulf %254, %258 : vector<1x8x8xf32>
    "tpu.trace_start"() <{level = 10 : i32, message = "bts,bsd->btd"}> : () -> ()
    %cst_74 = arith.constant dense<0.000000e+00> : vector<1x8x8xf32>
    %260 = tpu.matmul %259, %247, %cst_74 {dimension_numbers = #tpu.dot_dimension_numbers<[2], [1], [1], [2], [0, 0, 0, 1, 1, 2], [0], [0]>} : vector<1x8x8xf32>, vector<1x8x8xf32>, vector<1x8x8xf32> -> vector<1x8x8xf32>
    "tpu.trace_stop"() : () -> ()
    %261 = vector.shape_cast %260 : vector<1x8x8xf32> to vector<8x8xf32>
    %c0_75 = arith.constant 0 : index
    %c104 = arith.constant 104 : index
    %262 = vector.load %arg7[%c0_75, %c104] : memref<8x128xf32, #tpu.memory_space<vmem>>, vector<8x8xf32>
    tpu.vector_store %arg7[%c0_75, %c104], %261 {strides = array<i32>} : memref<8x128xf32, #tpu.memory_space<vmem>>, vector<8x8xf32>,
    %263 = vector.extract_strided_slice %4 {offsets = [0, 0, 112], sizes = [1, 8, 8], strides = [1, 1, 1]} : vector<1x8x128xf32> to vector<1x8x8xf32>
    %264 = vector.extract_strided_slice %6 {offsets = [0, 0, 112], sizes = [1, 8, 8], strides = [1, 1, 1]} : vector<1x8x128xf32> to vector<1x8x8xf32>
    %265 = vector.extract_strided_slice %8 {offsets = [0, 0, 112], sizes = [1, 8, 8], strides = [1, 1, 1]} : vector<1x8x128xf32> to vector<1x8x8xf32>
    "tpu.trace_start"() <{level = 10 : i32, message = "btd,bsd->bts"}> : () -> ()
    %cst_76 = arith.constant dense<0.000000e+00> : vector<1x8x8xf32>
    %266 = tpu.matmul %263, %264, %cst_76 {dimension_numbers = #tpu.dot_dimension_numbers<[2], [2], [1], [1], [0, 0, 0, 1, 1, 1], [0], [0]>} : vector<1x8x8xf32>, vector<1x8x8xf32>, vector<1x8x8xf32> -> vector<1x8x8xf32>
    "tpu.trace_stop"() : () -> ()
    %267 = arith.addf %266, %10 : vector<1x8x8xf32>
    %cst_77 = arith.constant dense<0xFF800000> : vector<1x8xf32>
    %268 = vector.multi_reduction <maximumf>, %267, %cst_77 [2] : vector<1x8x8xf32> to vector<1x8xf32>
    %269 = vector.shape_cast %268 : vector<1x8xf32> to vector<1x8x1xf32>
    %270 = vector.broadcast %269 : vector<1x8x1xf32> to vector<1x8x8xf32>
    %271 = arith.subf %267, %270 : vector<1x8x8xf32>
    %272 = math.exp %271 : vector<1x8x8xf32>
    %cst_78 = arith.constant dense<0.000000e+00> : vector<1x8xf32>
    %273 = vector.multi_reduction <add>, %272, %cst_78 [2] : vector<1x8x8xf32> to vector<1x8xf32>
    %274 = vector.shape_cast %273 : vector<1x8xf32> to vector<1x8x1xf32>
    %275 = tpu.reciprocal %274 {approx = true} : vector<1x8x1xf32> -> vector<1x8x1xf32>
    %276 = vector.broadcast %275 : vector<1x8x1xf32> to vector<1x8x8xf32>
    %277 = arith.mulf %272, %276 : vector<1x8x8xf32>
    "tpu.trace_start"() <{level = 10 : i32, message = "bts,bsd->btd"}> : () -> ()
    %cst_79 = arith.constant dense<0.000000e+00> : vector<1x8x8xf32>
    %278 = tpu.matmul %277, %265, %cst_79 {dimension_numbers = #tpu.dot_dimension_numbers<[2], [1], [1], [2], [0, 0, 0, 1, 1, 2], [0], [0]>} : vector<1x8x8xf32>, vector<1x8x8xf32>, vector<1x8x8xf32> -> vector<1x8x8xf32>
    "tpu.trace_stop"() : () -> ()
    %279 = vector.shape_cast %278 : vector<1x8x8xf32> to vector<8x8xf32>
    %c0_80 = arith.constant 0 : index
    %c112 = arith.constant 112 : index
    %280 = vector.load %arg7[%c0_80, %c112] : memref<8x128xf32, #tpu.memory_space<vmem>>, vector<8x8xf32>
    tpu.vector_store %arg7[%c0_80, %c112], %279 {strides = array<i32>} : memref<8x128xf32, #tpu.memory_space<vmem>>, vector<8x8xf32>,
    %281 = vector.extract_strided_slice %4 {offsets = [0, 0, 120], sizes = [1, 8, 8], strides = [1, 1, 1]} : vector<1x8x128xf32> to vector<1x8x8xf32>
    %282 = vector.extract_strided_slice %6 {offsets = [0, 0, 120], sizes = [1, 8, 8], strides = [1, 1, 1]} : vector<1x8x128xf32> to vector<1x8x8xf32>
    %283 = vector.extract_strided_slice %8 {offsets = [0, 0, 120], sizes = [1, 8, 8], strides = [1, 1, 1]} : vector<1x8x128xf32> to vector<1x8x8xf32>
    "tpu.trace_start"() <{level = 10 : i32, message = "btd,bsd->bts"}> : () -> ()
    %cst_81 = arith.constant dense<0.000000e+00> : vector<1x8x8xf32>
    %284 = tpu.matmul %281, %282, %cst_81 {dimension_numbers = #tpu.dot_dimension_numbers<[2], [2], [1], [1], [0, 0, 0, 1, 1, 1], [0], [0]>} : vector<1x8x8xf32>, vector<1x8x8xf32>, vector<1x8x8xf32> -> vector<1x8x8xf32>
    "tpu.trace_stop"() : () -> ()
    %285 = arith.addf %284, %10 : vector<1x8x8xf32>
    %cst_82 = arith.constant dense<0xFF800000> : vector<1x8xf32>
    %286 = vector.multi_reduction <maximumf>, %285, %cst_82 [2] : vector<1x8x8xf32> to vector<1x8xf32>
    %287 = vector.shape_cast %286 : vector<1x8xf32> to vector<1x8x1xf32>
    %288 = vector.broadcast %287 : vector<1x8x1xf32> to vector<1x8x8xf32>
    %289 = arith.subf %285, %288 : vector<1x8x8xf32>
    %290 = math.exp %289 : vector<1x8x8xf32>
    %cst_83 = arith.constant dense<0.000000e+00> : vector<1x8xf32>
    %291 = vector.multi_reduction <add>, %290, %cst_83 [2] : vector<1x8x8xf32> to vector<1x8xf32>
    %292 = vector.shape_cast %291 : vector<1x8xf32> to vector<1x8x1xf32>
    %293 = tpu.reciprocal %292 {approx = true} : vector<1x8x1xf32> -> vector<1x8x1xf32>
    %294 = vector.broadcast %293 : vector<1x8x1xf32> to vector<1x8x8xf32>
    %295 = arith.mulf %290, %294 : vector<1x8x8xf32>
    "tpu.trace_start"() <{level = 10 : i32, message = "bts,bsd->btd"}> : () -> ()
    %cst_84 = arith.constant dense<0.000000e+00> : vector<1x8x8xf32>
    %296 = tpu.matmul %295, %283, %cst_84 {dimension_numbers = #tpu.dot_dimension_numbers<[2], [1], [1], [2], [0, 0, 0, 1, 1, 2], [0], [0]>} : vector<1x8x8xf32>, vector<1x8x8xf32>, vector<1x8x8xf32> -> vector<1x8x8xf32>
    "tpu.trace_stop"() : () -> ()
    %297 = vector.shape_cast %296 : vector<1x8x8xf32> to vector<8x8xf32>
    %c0_85 = arith.constant 0 : index
    %c120 = arith.constant 120 : index
    %298 = vector.load %arg7[%c0_85, %c120] : memref<8x128xf32, #tpu.memory_space<vmem>>, vector<8x8xf32>
    tpu.vector_store %arg7[%c0_85, %c120], %297 {strides = array<i32>} : memref<8x128xf32, #tpu.memory_space<vmem>>, vector<8x8xf32>,
    %c0_86 = arith.constant 0 : index
    %c0_87 = arith.constant 0 : index
    %299 = vector.load %arg7[%c0_86, %c0_87] : memref<8x128xf32, #tpu.memory_space<vmem>>, vector<8x128xf32>
    %c0_88 = arith.constant 0 : index
    %c0_89 = arith.constant 0 : index
    %300 = vector.load %arg3[%c0_88, %c0_89] : memref<128x128xf32, #tpu.memory_space<vmem>>, vector<128x128xf32>
    %cst_90 = arith.constant dense<0.000000e+00> : vector<8x128xf32>
    %301 = tpu.matmul %299, %300, %cst_90 {dimension_numbers = #tpu.dot_dimension_numbers<[1], [0], [0], [1], [0, 0, 1, 1], [], []>} : vector<8x128xf32>, vector<128x128xf32>, vector<8x128xf32> -> vector<8x128xf32>
    %c0_91 = arith.constant 0 : index
    %c0_92 = arith.constant 0 : index
    %302 = vector.load %arg4[%c0_91, %c0_92] : memref<1x128xf32, #tpu.memory_space<vmem>>, vector<1x128xf32>
    %303 = vector.broadcast %302 : vector<1x128xf32> to vector<8x128xf32>
    %304 = arith.addf %301, %303 : vector<8x128xf32>
    %c0_93 = arith.constant 0 : index
    %c0_94 = arith.constant 0 : index
    %305 = vector.load %arg6[%c0_93, %c0_94] : memref<8x128xf32, #tpu.memory_space<vmem>>, vector<8x128xf32>
    tpu.vector_store %arg6[%c0_93, %c0_94], %304 {strides = array<i32>} : memref<8x128xf32, #tpu.memory_space<vmem>>, vector<8x128xf32>,
    return
  }
  func.func @transform_0(%arg0: i32) -> (i32, i32) {
    %c0_i32 = arith.constant 0 : i32
    %c0_i32_0 = arith.constant 0 : i32
    return %arg0, %c0_i32 : i32, i32
  }
  func.func @transform_1(%arg0: i32) -> (i32, i32) {
    %c0_i32 = arith.constant 0 : i32
    %c0_i32_0 = arith.constant 0 : i32
    %c0_i32_1 = arith.constant 0 : i32
    return %c0_i32, %c0_i32_0 : i32, i32
  }
  func.func @transform_2(%arg0: i32) -> (i32, i32) {
    %c0_i32 = arith.constant 0 : i32
    %c0_i32_0 = arith.constant 0 : i32
    %c0_i32_1 = arith.constant 0 : i32
    return %c0_i32, %c0_i32_0 : i32, i32
  }
  func.func @transform_3(%arg0: i32) -> (i32, i32) {
    %c0_i32 = arith.constant 0 : i32
    %c0_i32_0 = arith.constant 0 : i32
    %c0_i32_1 = arith.constant 0 : i32
    return %c0_i32, %c0_i32_0 : i32, i32
  }
  func.func @transform_4(%arg0: i32) -> (i32, i32) {
    %c0_i32 = arith.constant 0 : i32
    %c0_i32_0 = arith.constant 0 : i32
    %c0_i32_1 = arith.constant 0 : i32
    return %c0_i32, %c0_i32_0 : i32, i32
  }
  func.func @transform_5(%arg0: i32) -> (i32, i32) {
    %c0_i32 = arith.constant 0 : i32
    %c0_i32_0 = arith.constant 0 : i32
    return %arg0, %c0_i32 : i32, i32
  }
}

</mosaic_0001>

<bundles_post_ra>
// kernel: tpu_custom_call.1
= control target key start
LH: loop header
LB: loop body
LE: loop exit
PB: predicated region body
PF: predicated region fallthrough
CT: control target
= control target key end

     0   :  { %10 = vsyncpa [#allocation4], 0  ;;  %s4221_s0 = inlined_call_operand.hbm [shape: f32[8,128], index: 0, kind: input, shape index: {}]   ;;  %s4222_s1 = inlined_call_operand.hbm [shape: f32[128,384], index: 1, kind: input, shape index: {}]   ;;  %s4223_s2 = inlined_call_operand.hbm [shape: f32[128,128], index: 2, kind: input, shape index: {}]   ;;  %s4224_s3 = inlined_call_operand.vmem [shape: f32[1,128], index: 3, kind: input, shape index: {}]   ;;  %s4225_s4 = inlined_call_operand.hbm [shape: f32[8,8], index: 4, kind: input, shape index: {}]   ;;  %s4226_s5 = inlined_call_operand.hbm [shape: f32[8,128], index: 5, kind: output, shape index: {}]  }
   0x1   :  { %11 = vsyncpa [#allocation7], 0 }
   0x2   :  { %12 = vsyncpa [#allocation10], 0 }
   0x3   :  { %13 = vsyncpa [#allocation5], 0  ;;  %s3676_s18 = smov [#allocation6]  }
   0x4   :  { %s29_s19 = sshll.u32 %s3676_s18, 4  ;;  %s30_s19 = int_to_ptr.vmem [resolvable:$true] %s29_s19 }
   0x5   :  { %s3576_s20 = scalar_lea.vmem %s30_s19, 6144  ;;  %p3581_p1 = scmp.lt.s32.totalorder %s30_s19, %s30_s19 }
   0x6   :  { %p3577_p0 = scmp.ne.s32.totalorder %s30_s19, %s3576_s20  ;;  %p3582_p2 = scmp.lt.s32.totalorder %s3576_s20, %s3576_s20 }
   0x8   :  { %p3583_p3 = por %p3582_p2, %p3581_p1 }
   0xa   :  { %p3584_p4 = pnand %p3583_p3, %p3577_p0 }
   0xc   :  { %3587 = shalt.err (!%p3584_p4)
}
   0xd   :  { %s3677_s21 = smov 384   ;;  %s3678_s22 = smov 24  }
   0xe   :  { %35 = dma.hbm_to_vmem [thread:$0]  %s4222_s1, 6144, %s30_s19, [#allocation7], %s3677_s21, %s3677_s21, %s3678_s22  }
   0xf   :  { %s3679_s25 = smov [#allocation3]   ;;  %s3680_s27 = smov [#allocation8]  }
  0x10   :  { %s20_s26 = sshll.u32 %s3679_s25, 4  ;;  %s41_s28 = sshll.u32 %s3680_s27, 4  ;;  %s21_s26 = int_to_ptr.vmem [resolvable:$true] %s20_s26  ;;  %s42_s28 = int_to_ptr.vmem [resolvable:$true] %s41_s28 }
  0x11   :  { %s3596_s29 = scalar_lea.vmem %s21_s26, 128  ;;  %p3601_p6 = scmp.lt.s32.totalorder %s21_s26, %s21_s26 }
  0x12   :  { %p3597_p5 = scmp.ne.s32.totalorder %s21_s26, %s3596_s29  ;;  %p3602_p7 = scmp.lt.s32.totalorder %s3596_s29, %s3596_s29 }
  0x14   :  { %p3603_p8 = por %p3602_p7, %p3601_p6 }
  0x16   :  { %p3604_p9 = pnand %p3603_p8, %p3597_p5 }
  0x18   :  { %3607 = shalt.err (!%p3604_p9)
}
  0x19   :  { %23 = dma.hbm_to_vmem [thread:$0]  %s4221_s0, 128, %s21_s26, [#allocation4]  }
  0x1a   :  { %s3616_s7 = scalar_lea.vmem %s42_s28, 2048  ;;  %p3621_p11 = scmp.lt.s32.totalorder %s42_s28, %s42_s28 }
  0x1b   :  { %p3617_p10 = scmp.ne.s32.totalorder %s42_s28, %s3616_s7  ;;  %p3622_p12 = scmp.lt.s32.totalorder %s3616_s7, %s3616_s7 }
  0x1d   :  { %p3623_p13 = por %p3622_p12, %p3621_p11 }
  0x1f   :  { %p3624_p0 = pnand %p3623_p13, %p3617_p10 }
  0x21   :  { %3627 = shalt.err (!%p3624_p0)
}
  0x22   :  { %s3681_s1 = smov 128   ;;  %s3682_s8 = smov 8  }
  0x23   :  { %47 = dma.hbm_to_vmem [thread:$0]  %s4223_s2, 2048, %s42_s28, [#allocation7], %s3681_s1, %s3681_s1, %s3682_s8  }
  0x24   :  { %s3683_s11 = smov [#allocation9]  }
  0x25   :  { %s56_s12 = sshll.u32 %s3683_s11, 4  ;;  %s57_s12 = int_to_ptr.vmem [resolvable:$true] %s56_s12 }
  0x26   :  { %s3636_s13 = scalar_lea.vmem %s57_s12, 128  ;;  %p3641_p2 = scmp.lt.s32.totalorder %s57_s12, %s57_s12 }
  0x27   :  { %p3637_p1 = scmp.ne.s32.totalorder %s57_s12, %s3636_s13  ;;  %p3642_p3 = scmp.lt.s32.totalorder %s3636_s13, %s3636_s13 }
  0x29   :  { %p3643_p4 = por %p3642_p3, %p3641_p2 }
  0x2b   :  { %p3644_p5 = pnand %p3643_p4, %p3637_p1 }
  0x2d   :  { %3647 = shalt.err (!%p3644_p5)
}
  0x2e   :  { %59 = dma.hbm_to_vmem [thread:$0]  %s4225_s4, 128, %s57_s12, [#allocation10]  }
  0x2f   :  { %3668 = dma.done.wait [#allocation4], 128  }
  0x30   :  { %3669 = vsyncadd [#allocation4], 4294967168 }
  0x31   :  { %3670 = dma.done.wait [#allocation7], 8192  }
  0x32   :  { %3671 = vsyncadd [#allocation7], 4294959104 }
  0x33   :  { %3672 = dma.done.wait [#allocation10], 128  }
  0x34   :  { %3673 = vsyncadd [#allocation10], 4294967168  ;;  %v3684_v0 = vmov 0.0   ;;  %vm3685_vm0 = vmmov 0   ;;  %v119_v1 = vld [vmem:[#allocation6 + $0x170] sm:$0xff]  ;;  %v118_v2 = vld [vmem:[#allocation6 + $0x168] sm:$0xff] }
  0x35   :  { %185 = vmatprep.mubr.f32.mxu0 %v3684_v0  ;;  %3250 = vmatprep.subr.mxu1 %v3684_v0  ;;  %v116_v3 = vld [vmem:[#allocation6 + $0x158] sm:$0xff]  ;;  %v115_v4 = vld [vmem:[#allocation6 + $0x150] sm:$0xff]  ;;  %v113_v5 = vld [vmem:[#allocation6 + $0x140] sm:$0xff]  ;;  %vm263_vm1 = vcmask 64512   ;;  %s3686_s2 = smov 120   ;;  %s3687_s4 = smov 112  }
  0x36   :  { %3282 = vmatprep.mubr.msk.f32.mxu1 %vm3685_vm0, %v3684_v0  ;;  %121 = vmatprep.subr.mxu0 %v119_v1  ;;  %v112_v6 = vld [vmem:[#allocation6 + $0x138] sm:$0xff]  ;;  %v110_v7 = vld [vmem:[#allocation6 + $0x128] sm:$0xff]  ;;  %v109_v8 = vld [vmem:[#allocation6 + $0x120] sm:$0xff]  ;;  %s3688_s15 = smov 104   ;;  %s3689_s16 = smov 96   ;;  %vm595_vm2 = vcmask 130112  }
  0x37   :  { %122 = vmatpush1.msra.mxu0 %v118_v2  ;;  %v107_v9 = vld [vmem:[#allocation6 + $0x110] sm:$0xff]  ;;  %v106_v10 = vld [vmem:[#allocation6 + $0x108] sm:$0xff]  ;;  %v104_v11 = vld [vmem:[#allocation6 + $0xf8] sm:$0xff]  ;;  %s3690_s17 = smov 88   ;;  %s3691_s18 = smov 72   ;;  %vm766_vm3 = vcmask 195712  }
  0x38   :  { %123 = vmatprep.subr.mxu0 %v116_v3  ;;  %v103_v12 = vld [vmem:[#allocation6 + $0xf0] sm:$0xff]  ;;  %v101_v13 = vld [vmem:[#allocation6 + $0xe0] sm:$0xff]  ;;  %v100_v14 = vld [vmem:[#allocation6 + $0xd8] sm:$0xff]  ;;  %s3692_s19 = smov 64   ;;  %s3693_s20 = smov 56   ;;  %vm937_vm4 = vcmask 261312  }
  0x39   :  { %124 = vmatpush1.msra.mxu0 %v115_v4  ;;  %v120_v15 = vld [vmem:[#allocation6 + $0x178] sm:$0xff]  ;;  %v117_v16 = vld [vmem:[#allocation6 + $0x160] sm:$0xff]  ;;  %v98_v17 = vld [vmem:[#allocation6 + $0xc8] sm:$0xff]  ;;  %s3694_s21 = smov 48   ;;  %s3695_s23 = smov 40   ;;  %vm1108_vm5 = vcmask 326912  }
  0x3a   :  { %125 = vmatprep.subr.mxu0 %v113_v5  ;;  %3251 = vmatpush3.msra.mxu1 %v120_v15  ;;  %v97_v18 = vld [vmem:[#allocation6 + $0xc0] sm:$0xff]  ;;  %v114_v19 = vld [vmem:[#allocation6 + $0x148] sm:$0xff]  ;;  %v95_v20 = vld [vmem:[#allocation6 + $0xb0] sm:$0xff]  ;;  %s3696_s24 = smov 32   ;;  %s3697_s25 = smov 16   ;;  %vm1279_vm6 = vcmask 392512  }
  0x3b   :  { %126 = vmatpush1.msra.mxu0 %v112_v6  ;;  %3252 = vmatprep.subr.mxu1 %v3684_v0  ;;  %v94_v21 = vld [vmem:[#allocation6 + $0xa8] sm:$0xff]  ;;  %v111_v22 = vld [vmem:[#allocation6 + $0x130] sm:$0xff]  ;;  %v92_v23 = vld [vmem:[#allocation6 + $0x98] sm:$0xff]  ;;  %s3698_s26 = smov 80   ;;  %vm1450_vm7 = vcmask 458112   ;;  %vm1621_vm8 = vcmask 523712  }
  0x3c   :  { %127 = vmatprep.subr.mxu0 %v110_v7  ;;  %3253 = vmatpush3.msra.mxu1 %v117_v16  ;;  %v91_v24 = vld [vmem:[#allocation6 + $0x90] sm:$0xff]  ;;  %v108_v25 = vld [vmem:[#allocation6 + $0x118] sm:$0xff]  ;;  %v89_v26 = vld [vmem:[#allocation6 + $0x80] sm:$0xff]  ;;  %vm1792_vm9 = vcmask 589312   ;;  %vm1963_vm10 = vcmask 654912   ;;  %vm2134_vm11 = vcmask 720512  }
  0x3d   :  { %128 = vmatpush1.msra.mxu0 %v109_v8  ;;  %3254 = vmatprep.subr.mxu1 %v3684_v0  ;;  %v88_v27 = vld [vmem:[#allocation6 + $0x78] sm:$0xff]  ;;  %v105_v28 = vld [vmem:[#allocation6 + $0x100] sm:$0xff]  ;;  %v86_v29 = vld [vmem:[#allocation6 + $0x68] sm:$0xff]  ;;  %vm2305_vm12 = vcmask 786112   ;;  %vm2476_vm13 = vcmask 851712   ;;  %vm2647_vm14 = vcmask 917312  }
  0x3e   :  { %129 = vmatprep.subr.mxu0 %v107_v9  ;;  %3255 = vmatpush3.msra.mxu1 %v114_v19  ;;  %v85_v30 = vld [vmem:[#allocation6 + $0x60] sm:$0xff]  ;;  %v102_v31 = vld [vmem:[#allocation6 + $0xe8] sm:$0xff]  ;;  %v83_v32 = vld [vmem:[#allocation6 + $0x50] sm:$0xff]  ;;  %vm2818_vm15 = vcmask 982912   ;;  %s3699_s28 = smov [#allocation11]  }
  0x3f   :  { %130 = vmatpush1.msra.mxu0 %v106_v10  ;;  %3256 = vmatprep.subr.mxu1 %v3684_v0  ;;  %v82_v33 = vld [vmem:[#allocation6 + $0x48] sm:$0xff]  ;;  %v99_v34 = vld [vmem:[#allocation6 + $0xd0] sm:$0xff]  ;;  %v80_v35 = vld [vmem:[#allocation6 + $0x38] sm:$0xff]  ;;  %s3092_s29 = sshll.u32 %s3699_s28, 4  ;;  %s3093_s29 = int_to_ptr.vmem [resolvable:$true] %s3092_s29 }
  0x40   :  { %131 = vmatprep.subr.mxu0 %v104_v11  ;;  %3257 = vmatpush3.msra.mxu1 %v111_v22  ;;  %v79_v36 = vld [vmem:[#allocation6 + $0x30] sm:$0xff]  ;;  %v96_v37 = vld [vmem:[#allocation6 + $0xb8] sm:$0xff]  ;;  %v77_v38 = vld [vmem:[#allocation6 + $0x20] sm:$0xff]  ;;  %s3648_s30 = scalar_lea.vmem %s3093_s29, 128  ;;  %p3653_p7 = scmp.lt.s32.totalorder %s3093_s29, %s3093_s29 }
  0x41   :  { %132 = vmatpush1.msra.mxu0 %v103_v12  ;;  %3258 = vmatprep.subr.mxu1 %v3684_v0  ;;  %v76_v39 = vld [vmem:[#allocation6 + $0x18] sm:$0xff]  ;;  %v93_v40 = vld [vmem:[#allocation6 + $0xa0] sm:$0xff]  ;;  %v74_v41 = vld [vmem:[#allocation6 + $0x8] sm:$0xff]  ;;  %p3649_p6 = scmp.ne.s32.totalorder %s3093_s29, %s3648_s30  ;;  %p3654_p8 = scmp.lt.s32.totalorder %s3648_s30, %s3648_s30 }
  0x42   :  { %133 = vmatprep.subr.mxu0 %v101_v13  ;;  %3259 = vmatpush3.msra.mxu1 %v108_v25  ;;  %v73_v42 = vld [vmem:[#allocation6] sm:$0xff]  ;;  %v90_v43 = vld [vmem:[#allocation6 + $0x88] sm:$0xff]  ;;  %v72_v44 = vld [vmem:[#allocation3] sm:$0xff] }
  0x43   :  { %134 = vmatpush1.msra.mxu0 %v100_v14  ;;  %3260 = vmatprep.subr.mxu1 %v3684_v0  ;;  %v87_v45 = vld [vmem:[#allocation6 + $0x70] sm:$0xff]  ;;  %v84_v46 = vld [vmem:[#allocation6 + $0x58] sm:$0xff]  ;;  %v81_v47 = vld [vmem:[#allocation6 + $0x40] sm:$0xff]  ;;  %p3655_p9 = por %p3654_p8, %p3653_p7 }
  0x44   :  { %135 = vmatprep.subr.mxu0 %v98_v17  ;;  %3261 = vmatpush3.msra.mxu1 %v105_v28  ;;  %v78_v48 = vld [vmem:[#allocation6 + $0x28] sm:$0xff]  ;;  %v75_v49 = vld [vmem:[#allocation6 + $0x10] sm:$0xff]  ;;  %v3788_v54 = vld [vmem:[#allocation9] sm:$0xff] }
  0x45   :  { %136 = vmatpush1.msra.mxu0 %v97_v18  ;;  %3262 = vmatprep.subr.mxu1 %v3684_v0  ;;  %p3656_p10 = pnand %p3655_p9, %p3649_p6 }
  0x46   :  { %137 = vmatprep.subr.mxu0 %v95_v20  ;;  %3263 = vmatpush3.msra.mxu1 %v102_v31 }
  0x47   :  { %138 = vmatpush1.msra.mxu0 %v94_v21  ;;  %3264 = vmatprep.subr.mxu1 %v3684_v0 }
  0x48   :  { %139 = vmatprep.subr.mxu0 %v92_v23  ;;  %3265 = vmatpush3.msra.mxu1 %v99_v34 }
  0x49   :  { %140 = vmatpush1.msra.mxu0 %v91_v24  ;;  %3266 = vmatprep.subr.mxu1 %v3684_v0 }
  0x4a   :  { %141 = vmatprep.subr.mxu0 %v89_v26  ;;  %3267 = vmatpush3.msra.mxu1 %v96_v37 }
  0x4b   :  { %142 = vmatpush1.msra.mxu0 %v88_v27  ;;  %3268 = vmatprep.subr.mxu1 %v3684_v0 }
  0x4c   :  { %143 = vmatprep.subr.mxu0 %v86_v29  ;;  %3269 = vmatpush3.msra.mxu1 %v93_v40 }
  0x4d   :  { %144 = vmatpush1.msra.mxu0 %v85_v30  ;;  %3270 = vmatprep.subr.mxu1 %v3684_v0 }
  0x4e   :  { %145 = vmatprep.subr.mxu0 %v83_v32  ;;  %3271 = vmatpush3.msra.mxu1 %v90_v43 }
  0x4f   :  { %146 = vmatpush1.msra.mxu0 %v82_v33  ;;  %3272 = vmatprep.subr.mxu1 %v3684_v0 }
  0x50   :  { %147 = vmatprep.subr.mxu0 %v80_v35  ;;  %3273 = vmatpush3.msra.mxu1 %v87_v45 }
  0x51   :  { %148 = vmatpush1.msra.mxu0 %v79_v36  ;;  %3274 = vmatprep.subr.mxu1 %v3684_v0 }
  0x52   :  { %149 = vmatprep.subr.mxu0 %v77_v38  ;;  %3275 = vmatpush3.msra.mxu1 %v84_v46 }
  0x53   :  { %150 = vmatpush1.msra.mxu0 %v76_v39  ;;  %3276 = vmatprep.subr.mxu1 %v3684_v0 }
  0x54   :  { %151 = vmatprep.subr.mxu0 %v74_v41  ;;  %3277 = vmatpush3.msra.mxu1 %v81_v47 }
  0x55   :  { %152 = vmatpush1.msra.mxu0 %v73_v42  ;;  %3278 = vmatprep.subr.mxu1 %v3684_v0 }
  0x56   :  { %186 = vmatmul.mubr.f32.vlgmr.msra.gmra.mxu0 %v72_v44  ;;  %3325 = vmatprep.subr.mxu0 %v3684_v0 }
  0x57   :  { %3327 = vmatprep.mubr.msk.f32.mxu0 %vm3685_vm0, %v3684_v0  ;;  %3279 = vmatpush3.msra.mxu1 %v78_v48 }
  0x58   :  { %3280 = vmatprep.subr.mxu1 %v3684_v0 }
  0x59   :  { %3281 = vmatpush3.msra.mxu1 %v75_v49 }
  0x5a   :  { %3283 = vmatmul.mubr.f32.vlgmr.msra.gmra.mxu1 %v72_v44  ;;  %3285 = vmatprep.subr.mxu1 %v3684_v0 }
  0x5b   :  { %3287 = vmatprep.mubr.msk.f32.mxu1 %vm3685_vm0, %v3684_v0 }
 0x116   :  { %v3769_v50 = vpop.f32.mrf.mxu0 }
 0x118   :  { %v3771_v51 = vpop.f32.mrf.mxu0 }
 0x119   :  { %427 = vrot.lane.b32.xlu1 %v3771_v51, %s3686_s2  ;;  %3286 = vmatpush3.xpose.msk.msra.mxu1 %vm263_vm1, %v3771_v51 }
 0x11a   :  { %3290 = vmatprep.subr.mxu1 %v3684_v0  ;;  %v3784_v52 = vpop.f32.mrf.mxu1 }
 0x11c   :  { %3288 = vmatmul.mubr.msk.f32.vlgmr.msra.gmra.mxu1 %vm263_vm1, %v3769_v50  ;;  %v3284_v53 = vpop.f32.mrf.mxu1 }
 0x11d   :  { %425 = vrot.lane.b32.xlu1 %v3769_v50, %s3686_s2  ;;  %3292 = vmatprep.mubr.msk.f32.mxu1 %vm3685_vm0, %v3684_v0 }
 0x11e   :  { %3291 = vmatpush3.msra.mxu1 %v3784_v52 }
 0x11f   :  { %3295 = vmatprep.subr.mxu1 %v3684_v0 }
 0x18b   :  { %v428_v3 = vpop.permute.xlu1 %427 }
 0x18f   :  { %v426_v5 = vpop.permute.xlu1 %425 }
 0x1dc   :  { %v336_v55 = vpop.f32.mrf.mxu1 }
 0x1dd   :  { %v337_v56 = vadd.f32 %v336_v55, %v3788_v54 }
 0x1de   :  { %v3289_v57 = vpop.f32.mrf.mxu1 }
 0x1df   :  { %v340_v58 = vsel %vm263_vm1, %v337_v56, -inf }
 0x1e0   :  { %341 = vmax.xlane.f32.xlu0 %v340_v58 }
 0x269   :  { %v342_v59 = vpop.xlane.xlu0 %341 }
 0x26a   :  { %v343_v60 = vsub.f32 %v337_v56, %v342_v59 }
 0x26c   :  { %v344_v61 = vmul.f32 1.442695, %v343_v60 }
 0x26e   :  { %3504 = vpow2.f32 %v344_v61 }
 0x27b   :  { %v3505_v62 = vpop.eup %3504 }
 0x27c   :  { %v346_v63 = vsel %vm263_vm1, %v3505_v62, 0.0 }
 0x27d   :  { %347 = vadd.xlane.f32.xlu0 %v346_v63 }
 0x306   :  { %v348_v1 = vpop.xlane.xlu0 %347 }
 0x307   :  { %3506 = vrcp.f32 %v348_v1 }
 0x314   :  { %v3507_v2 = vpop.eup %3506 }
 0x315   :  { %v350_v4 = vmul.f32 %v3507_v2, %v3505_v62 }
 0x317   :  { %3293 = vmatmul.mubr.msk.f32.vlgmr.msra.gmra.mxu1 %vm263_vm1, %v350_v4 }
 0x318   :  { %3296 = vmatpush3.xpose.msk.msra.mxu1 %vm263_vm1, %v428_v3  ;;  %3297 = vmatprep.mubr.msk.f32.mxu1 %vm3685_vm0, %v3684_v0 }
 0x319   :  { %3300 = vmatprep.subr.mxu1 %v3684_v0 }
 0x31b   :  { %3298 = vmatmul.mubr.msk.f32.vlgmr.msra.gmra.mxu1 %vm263_vm1, %v426_v5 }
 0x31c   :  { %3302 = vmatprep.mubr.msk.f32.mxu1 %vm3685_vm0, %v3684_v0 }
 0x3d7   :  { %v420_v6 = vpop.f32.mrf.mxu1 }
 0x3d8   :  { %424 = vst.msk [vmem:[#allocation2] sm:$0xff] %vm263_vm1, %v420_v6 }
 0x3d9   :  { %v3294_v7 = vpop.f32.mrf.mxu1 }
 0x3db   :  { %v499_v8 = vpop.f32.mrf.mxu1 }
 0x3dc   :  { %v500_v9 = vadd.f32 %v499_v8, %v3788_v54 }
 0x3dd   :  { %v3299_v10 = vpop.f32.mrf.mxu1 }
 0x3de   :  { %v503_v11 = vsel %vm263_vm1, %v500_v9, -inf }
 0x3df   :  { %504 = vmax.xlane.f32.xlu0 %v503_v11 }
 0x3f5   :  { %515 = vrot.lane.b32.xlu0 %v3784_v52, %s3686_s2 }
 0x3f9   :  { %599 = vrot.lane.b32.xlu0 %v3771_v51, %s3687_s4 }
 0x3fd   :  { %597 = vrot.lane.b32.xlu0 %v3769_v50, %s3687_s4 }
 0x468   :  { %v505_v12 = vpop.xlane.xlu0 %504 }
 0x469   :  { %v506_v13 = vsub.f32 %v500_v9, %v505_v12 }
 0x46b   :  { %v507_v14 = vmul.f32 1.442695, %v506_v13 }
 0x46c   :  { %v516_v15 = vpop.permute.xlu0 %515 }
 0x46d   :  { %3508 = vpow2.f32 %v507_v14  ;;  %3301 = vmatpush3.msra.mxu1 %v516_v15 }
 0x46e   :  { %3305 = vmatprep.subr.mxu1 %v3684_v0 }
 0x470   :  { %v600_v20 = vpop.permute.xlu0 %599 }
 0x474   :  { %v598_v22 = vpop.permute.xlu0 %597 }
 0x47a   :  { %v3509_v16 = vpop.eup %3508 }
 0x47b   :  { %v509_v17 = vsel %vm263_vm1, %v3509_v16, 0.0 }
 0x47c   :  { %510 = vadd.xlane.f32.xlu1 %v509_v17 }
 0x48d   :  { %686 = vrot.lane.b32.xlu1 %v3784_v52, %s3687_s4 }
 0x491   :  { %770 = vrot.lane.b32.xlu1 %v3771_v51, %s3688_s15 }
 0x495   :  { %768 = vrot.lane.b32.xlu1 %v3769_v50, %s3688_s15 }
 0x499   :  { %939 = vrot.lane.b32.xlu1 %v3769_v50, %s3689_s16 }
 0x49d   :  { %1112 = vrot.lane.b32.xlu1 %v3771_v51, %s3690_s17 }
 0x505   :  { %v511_v18 = vpop.xlane.xlu1 %510 }
 0x506   :  { %3510 = vrcp.f32 %v511_v18 }
 0x509   :  { %v687_v23 = vpop.permute.xlu1 %686 }
 0x50d   :  { %v771_v30 = vpop.permute.xlu1 %770 }
 0x511   :  { %v769_v31 = vpop.permute.xlu1 %768 }
 0x513   :  { %v3511_v19 = vpop.eup %3510 }
 0x514   :  { %v513_v21 = vmul.f32 %v3511_v19, %v3509_v16 }
 0x515   :  { %v940_v34 = vpop.permute.xlu1 %939 }
 0x516   :  { %3303 = vmatmul.mubr.msk.f32.vlgmr.msra.gmra.mxu1 %vm263_vm1, %v513_v21 }
 0x517   :  { %3306 = vmatpush3.xpose.msk.msra.mxu1 %vm263_vm1, %v600_v20  ;;  %3307 = vmatprep.mubr.msk.f32.mxu1 %vm3685_vm0, %v3684_v0 }
 0x518   :  { %3310 = vmatprep.subr.mxu1 %v3684_v0 }
 0x519   :  { %v1113_v37 = vpop.permute.xlu1 %1112 }
 0x51a   :  { %3308 = vmatmul.mubr.msk.f32.vlgmr.msra.gmra.mxu1 %vm263_vm1, %v598_v22 }
 0x51b   :  { %3311 = vmatpush3.msra.mxu1 %v687_v23  ;;  %3312 = vmatprep.mubr.msk.f32.mxu1 %vm3685_vm0, %v3684_v0 }
 0x51c   :  { %3315 = vmatprep.subr.mxu1 %v3684_v0 }
 0x5d6   :  { %v3831_v24 = vpop.f32.mrf.mxu1 }
 0x5d8   :  { %v3304_v25 = vpop.f32.mrf.mxu1 }
 0x5da   :  { %v671_v26 = vpop.f32.mrf.mxu1 }
 0x5db   :  { %v672_v27 = vadd.f32 %v671_v26, %v3788_v54 }
 0x5dc   :  { %v3309_v28 = vpop.f32.mrf.mxu1 }
 0x5dd   :  { %v675_v29 = vsel %vm263_vm1, %v672_v27, -inf }
 0x5de   :  { %676 = vmax.xlane.f32.xlu0 %v675_v29 }
 0x5f4   :  { %941 = vrot.lane.b32.xlu0 %v3771_v51, %s3689_s16 }
 0x5f8   :  { %1452 = vrot.lane.b32.xlu0 %v3769_v50, %s3691_s18 }
 0x5fc   :  { %1623 = vrot.lane.b32.xlu0 %v3769_v50, %s3692_s19 }
 0x600   :  { %1794 = vrot.lane.b32.xlu0 %v3769_v50, %s3693_s20 }
 0x604   :  { %1965 = vrot.lane.b32.xlu0 %v3769_v50, %s3694_s21 }
 0x608   :  { %2136 = vrot.lane.b32.xlu0 %v3769_v50, %s3695_s23 }
 0x60c   :  { %2307 = vrot.lane.b32.xlu0 %v3769_v50, %s3696_s24 }
 0x610   :  { %2478 = vrot.lane.b32.xlu0 %v3769_v50, %s3678_s22 }
 0x614   :  { %2649 = vrot.lane.b32.xlu0 %v3769_v50, %s3697_s25 }
 0x618   :  { %2820 = vrot.lane.b32.xlu0 %v3769_v50, %s3682_s8 }
 0x667   :  { %v677_v32 = vpop.xlane.xlu0 %676 }
 0x668   :  { %v678_v33 = vsub.f32 %v672_v27, %v677_v32 }
 0x66a   :  { %v679_v35 = vmul.f32 1.442695, %v678_v33 }
 0x66b   :  { %v942_v36 = vpop.permute.xlu0 %941 }
 0x66c   :  { %3512 = vpow2.f32 %v679_v35  ;;  %3326 = vmatpush3.xpose.msk.msra.mxu0 %vm263_vm1, %v942_v36 }
 0x66d   :  { %3335 = vmatprep.subr.mxu0 %v3684_v0 }
 0x66f   :  { %3328 = vmatmul.mubr.msk.f32.vlgmr.msra.gmra.mxu0 %vm263_vm1, %v940_v34  ;;  %v1453_v41 = vpop.permute.xlu0 %1452 }
 0x670   :  { %3336 = vmatpush3.xpose.msk.msra.mxu0 %vm263_vm1, %v1113_v37  ;;  %3337 = vmatprep.mubr.msk.f32.mxu0 %vm3685_vm0, %v3684_v0 }
 0x671   :  { %3345 = vmatprep.subr.mxu0 %v3684_v0 }
 0x673   :  { %v1624_v44 = vpop.permute.xlu0 %1623 }
 0x677   :  { %v1795_v47 = vpop.permute.xlu0 %1794 }
 0x679   :  { %v3513_v38 = vpop.eup %3512 }
 0x67a   :  { %v681_v39 = vsel %vm263_vm1, %v3513_v38, 0.0 }
 0x67b   :  { %682 = vadd.xlane.f32.xlu1 %v681_v39 }
 0x68c   :  { %1110 = vrot.lane.b32.xlu1 %v3769_v50, %s3690_s17 }
 0x690   :  { %1283 = vrot.lane.b32.xlu1 %v3771_v51, %s3698_s26 }
 0x694   :  { %1281 = vrot.lane.b32.xlu1 %v3769_v50, %s3698_s26 }
 0x698   :  { %1454 = vrot.lane.b32.xlu1 %v3771_v51, %s3691_s18 }
 0x69c   :  { %1625 = vrot.lane.b32.xlu1 %v3771_v51, %s3692_s19 }
 0x6a0   :  { %1796 = vrot.lane.b32.xlu1 %v3771_v51, %s3693_s20 }
 0x6a4   :  { %1967 = vrot.lane.b32.xlu1 %v3771_v51, %s3694_s21 }
 0x6a8   :  { %2138 = vrot.lane.b32.xlu1 %v3771_v51, %s3695_s23 }
 0x6ac   :  { %2309 = vrot.lane.b32.xlu1 %v3771_v51, %s3696_s24 }
 0x6b0   :  { %2480 = vrot.lane.b32.xlu1 %v3771_v51, %s3678_s22 }
 0x6b4   :  { %2651 = vrot.lane.b32.xlu1 %v3771_v51, %s3697_s25 }
 0x6b8   :  { %2822 = vrot.lane.b32.xlu1 %v3771_v51, %s3682_s8  ;;  %v1966_v51 = vpop.permute.xlu0 %1965 }
 0x6bc   :  { %v2137_v55 = vpop.permute.xlu0 %2136 }
 0x6c0   :  { %v2308_v58 = vpop.permute.xlu0 %2307 }
 0x6c4   :  { %v2479_v60 = vpop.permute.xlu0 %2478 }
 0x6c8   :  { %v2650_v2 = vpop.permute.xlu0 %2649 }
 0x6cc   :  { %v2821_v6 = vpop.permute.xlu0 %2820 }
 0x704   :  { %v683_v40 = vpop.xlane.xlu1 %682 }
 0x705   :  { %3514 = vrcp.f32 %v683_v40 }
 0x708   :  { %v1111_v42 = vpop.permute.xlu1 %1110 }
 0x709   :  { %3338 = vmatmul.mubr.msk.f32.vlgmr.msra.gmra.mxu0 %vm263_vm1, %v1111_v42 }
 0x70a   :  { %3347 = vmatprep.mubr.msk.f32.mxu0 %vm3685_vm0, %v3684_v0 }
 0x70c   :  { %v1284_v43 = vpop.permute.xlu1 %1283 }
 0x70d   :  { %3346 = vmatpush3.xpose.msk.msra.mxu0 %vm263_vm1, %v1284_v43 }
 0x70e   :  { %3355 = vmatprep.subr.mxu0 %v3684_v0 }
 0x710   :  { %v1282_v45 = vpop.permute.xlu1 %1281 }
 0x711   :  { %3348 = vmatmul.mubr.msk.f32.vlgmr.msra.gmra.mxu0 %vm263_vm1, %v1282_v45 }
 0x712   :  { %v3515_v46 = vpop.eup %3514  ;;  %3357 = vmatprep.mubr.msk.f32.mxu0 %vm3685_vm0, %v3684_v0 }
 0x713   :  { %v685_v48 = vmul.f32 %v3515_v46, %v3513_v38 }
 0x714   :  { %v1455_v49 = vpop.permute.xlu1 %1454 }
 0x715   :  { %3313 = vmatmul.mubr.msk.f32.vlgmr.msra.gmra.mxu1 %vm263_vm1, %v685_v48  ;;  %3356 = vmatpush3.xpose.msk.msra.mxu0 %vm263_vm1, %v1455_v49 }
 0x716   :  { %3316 = vmatpush3.xpose.msk.msra.mxu1 %vm263_vm1, %v771_v30  ;;  %3317 = vmatprep.mubr.msk.f32.mxu1 %vm3685_vm0, %v3684_v0 }
 0x717   :  { %3365 = vmatprep.subr.mxu0 %v3684_v0  ;;  %3320 = vmatprep.subr.mxu1 %v3684_v0 }
 0x718   :  { %v1626_v50 = vpop.permute.xlu1 %1625  ;;  %3358 = vmatmul.mubr.msk.f32.vlgmr.msra.gmra.mxu0 %vm263_vm1, %v1453_v41 }
 0x719   :  { %3318 = vmatmul.mubr.msk.f32.vlgmr.msra.gmra.mxu1 %vm263_vm1, %v769_v31  ;;  %3366 = vmatpush3.xpose.msk.msra.mxu0 %vm263_vm1, %v1626_v50 }
 0x71a   :  { %3367 = vmatprep.mubr.msk.f32.mxu0 %vm3685_vm0, %v3684_v0  ;;  %3375 = vmatprep.subr.mxu0 %v3684_v0 }
 0x71b   :  { %3322 = vmatprep.mubr.msk.f32.mxu1 %vm3685_vm0, %v3684_v0 }
 0x71c   :  { %v1797_v53 = vpop.permute.xlu1 %1796  ;;  %3368 = vmatmul.mubr.msk.f32.vlgmr.msra.gmra.mxu0 %vm263_vm1, %v1624_v44 }
 0x71d   :  { %3376 = vmatpush3.xpose.msk.msra.mxu0 %vm263_vm1, %v1797_v53  ;;  %3377 = vmatprep.mubr.msk.f32.mxu0 %vm3685_vm0, %v3684_v0 }
 0x71e   :  { %3385 = vmatprep.subr.mxu0 %v3684_v0 }
 0x720   :  { %v1968_v56 = vpop.permute.xlu1 %1967  ;;  %3378 = vmatmul.mubr.msk.f32.vlgmr.msra.gmra.mxu0 %vm263_vm1, %v1795_v47 }
 0x721   :  { %3386 = vmatpush3.xpose.msk.msra.mxu0 %vm263_vm1, %v1968_v56  ;;  %3387 = vmatprep.mubr.msk.f32.mxu0 %vm3685_vm0, %v3684_v0 }
 0x722   :  { %3395 = vmatprep.subr.mxu0 %v3684_v0 }
 0x724   :  { %v2139_v57 = vpop.permute.xlu1 %2138  ;;  %3388 = vmatmul.mubr.msk.f32.vlgmr.msra.gmra.mxu0 %vm263_vm1, %v1966_v51 }
 0x725   :  { %3396 = vmatpush3.xpose.msk.msra.mxu0 %vm263_vm1, %v2139_v57  ;;  %3397 = vmatprep.mubr.msk.f32.mxu0 %vm3685_vm0, %v3684_v0 }
 0x726   :  { %3405 = vmatprep.subr.mxu0 %v3684_v0 }
 0x728   :  { %v2310_v59 = vpop.permute.xlu1 %2309  ;;  %3398 = vmatmul.mubr.msk.f32.vlgmr.msra.gmra.mxu0 %vm263_vm1, %v2137_v55 }
 0x729   :  { %3406 = vmatpush3.xpose.msk.msra.mxu0 %vm263_vm1, %v2310_v59  ;;  %3407 = vmatprep.mubr.msk.f32.mxu0 %vm3685_vm0, %v3684_v0 }
 0x72a   :  { %3415 = vmatprep.subr.mxu0 %v3684_v0 }
 0x72c   :  { %v2481_v61 = vpop.permute.xlu1 %2480  ;;  %3408 = vmatmul.mubr.msk.f32.vlgmr.msra.gmra.mxu0 %vm263_vm1, %v2308_v58 }
 0x72d   :  { %3416 = vmatpush3.xpose.msk.msra.mxu0 %vm263_vm1, %v2481_v61  ;;  %3417 = vmatprep.mubr.msk.f32.mxu0 %vm3685_vm0, %v3684_v0 }
 0x72e   :  { %3425 = vmatprep.subr.mxu0 %v3684_v0 }
 0x72f   :  { %v1013_v62 = vpop.f32.mrf.mxu0 }
 0x730   :  { %v1014_v63 = vadd.f32 %v1013_v62, %v3788_v54  ;;  %v2652_v1 = vpop.permute.xlu1 %2651  ;;  %3418 = vmatmul.mubr.msk.f32.vlgmr.msra.gmra.mxu0 %vm263_vm1, %v2479_v60 }
 0x731   :  { %v3329_v3 = vpop.f32.mrf.mxu0  ;;  %3426 = vmatpush3.xpose.msk.msra.mxu0 %vm263_vm1, %v2652_v1  ;;  %3427 = vmatprep.mubr.msk.f32.mxu0 %vm3685_vm0, %v3684_v0 }
 0x732   :  { %v1017_v4 = vsel %vm263_vm1, %v1014_v63, -inf  ;;  %3435 = vmatprep.subr.mxu0 %v3684_v0 }
 0x733   :  { %1018 = vmax.xlane.f32.xlu0 %v1017_v4 }
 0x734   :  { %v2823_v5 = vpop.permute.xlu1 %2822  ;;  %3428 = vmatmul.mubr.msk.f32.vlgmr.msra.gmra.mxu0 %vm263_vm1, %v2650_v2 }
 0x735   :  { %3436 = vmatpush3.xpose.msk.msra.mxu0 %vm263_vm1, %v2823_v5  ;;  %3437 = vmatprep.mubr.msk.f32.mxu0 %vm3685_vm0, %v3684_v0 }
 0x736   :  { %3445 = vmatprep.subr.mxu0 %v3684_v0 }
 0x738   :  { %3438 = vmatmul.mubr.msk.f32.vlgmr.msra.gmra.mxu0 %vm263_vm1, %v2821_v6 }
 0x739   :  { %3477 = vmatprep.mubr.msk.f32.mxu0 %vm3685_vm0, %v3684_v0 }
 0x7bc   :  { %v1019_v32 = vpop.xlane.xlu0 %1018 }
 0x7bd   :  { %v1020_v36 = vsub.f32 %v1014_v63, %v1019_v32 }
 0x7bf   :  { %v1021_v41 = vmul.f32 1.442695, %v1020_v36 }
 0x7c1   :  { %3516 = vpow2.f32 %v1021_v41 }
 0x7c9   :  { %v1184_v7 = vpop.f32.mrf.mxu0 }
 0x7ca   :  { %v3951_v8 = vadd.f32 %v1184_v7, %v3788_v54 }
 0x7cb   :  { %v3339_v9 = vpop.f32.mrf.mxu0 }
 0x7cc   :  { %v1188_v10 = vsel %vm263_vm1, %v3951_v8, -inf }
 0x7cd   :  { %1189 = vmax.xlane.f32.xlu0 %v1188_v10 }
 0x7ce   :  { %v4009_v61 = vpop.eup %3516 }
 0x7cf   :  { %v1023_v62 = vsel %vm263_vm1, %v4009_v61, 0.0 }
 0x7d1   :  { %v1355_v11 = vpop.f32.mrf.mxu0 }
 0x7d2   :  { %v3956_v12 = vadd.f32 %v1355_v11, %v3788_v54 }
 0x7d3   :  { %v3349_v13 = vpop.f32.mrf.mxu0 }
 0x7d4   :  { %v1359_v14 = vsel %vm263_vm1, %v3956_v12, -inf }
 0x7d5   :  { %1360 = vmax.xlane.f32.xlu1 %v1359_v14  ;;  %v3960_v15 = vpop.f32.mrf.mxu1 }
 0x7d7   :  { %v3314_v16 = vpop.f32.mrf.mxu1 }
 0x7d8   :  { %v1526_v17 = vpop.f32.mrf.mxu0 }
 0x7d9   :  { %v3963_v18 = vadd.f32 %v1526_v17, %v3788_v54  ;;  %v3965_v19 = vpop.f32.mrf.mxu1 }
 0x7da   :  { %v3359_v20 = vpop.f32.mrf.mxu0 }
 0x7db   :  { %v3319_v21 = vpop.f32.mrf.mxu1  ;;  %v1530_v22 = vsel %vm263_vm1, %v3963_v18, -inf }
 0x7dc   :  { %1531 = vmax.xlane.f32.xlu0 %v1530_v22  ;;  %v1697_v23 = vpop.f32.mrf.mxu0 }
 0x7dd   :  { %v3970_v25 = vadd.f32 %v1697_v23, %v3788_v54 }
 0x7de   :  { %v3369_v26 = vpop.f32.mrf.mxu0 }
 0x7df   :  { %v1701_v27 = vsel %vm263_vm1, %v3970_v25, -inf }
 0x7e0   :  { %1702 = vmax.xlane.f32.xlu1 %v1701_v27  ;;  %v1868_v28 = vpop.f32.mrf.mxu0 }
 0x7e1   :  { %v3975_v29 = vadd.f32 %v1868_v28, %v3788_v54 }
 0x7e2   :  { %v3379_v30 = vpop.f32.mrf.mxu0 }
 0x7e3   :  { %v1872_v31 = vsel %vm263_vm1, %v3975_v29, -inf }
 0x7e4   :  { %1873 = vmax.xlane.f32.xlu0 %v1872_v31  ;;  %v2039_v33 = vpop.f32.mrf.mxu0 }
 0x7e5   :  { %v3980_v34 = vadd.f32 %v2039_v33, %v3788_v54 }
 0x7e6   :  { %v3389_v35 = vpop.f32.mrf.mxu0 }
 0x7e7   :  { %v2043_v37 = vsel %vm263_vm1, %v3980_v34, -inf }
 0x7e8   :  { %2044 = vmax.xlane.f32.xlu1 %v2043_v37  ;;  %v2210_v38 = vpop.f32.mrf.mxu0 }
 0x7e9   :  { %v3985_v39 = vadd.f32 %v2210_v38, %v3788_v54 }
 0x7ea   :  { %v3399_v40 = vpop.f32.mrf.mxu0 }
 0x7eb   :  { %v2214_v42 = vsel %vm263_vm1, %v3985_v39, -inf }
 0x7ec   :  { %2215 = vmax.xlane.f32.xlu0 %v2214_v42  ;;  %v2381_v43 = vpop.f32.mrf.mxu0 }
 0x7ed   :  { %v3990_v44 = vadd.f32 %v2381_v43, %v3788_v54 }
 0x7ee   :  { %v3409_v45 = vpop.f32.mrf.mxu0 }
 0x7ef   :  { %v2385_v46 = vsel %vm263_vm1, %v3990_v44, -inf }
 0x7f0   :  { %2386 = vmax.xlane.f32.xlu1 %v2385_v46  ;;  %v2552_v47 = vpop.f32.mrf.mxu0  ;;  %v843_v46 = vadd.f32 %v3965_v19, %v3788_v54 }
 0x7f1   :  { %v3995_v48 = vadd.f32 %v2552_v47, %v3788_v54 }
 0x7f2   :  { %v3419_v49 = vpop.f32.mrf.mxu0  ;;  %v846_v47 = vsel %vm263_vm1, %v843_v46, -inf }
 0x7f3   :  { %v2556_v50 = vsel %vm263_vm1, %v3995_v48, -inf }
 0x7f4   :  { %2557 = vmax.xlane.f32.xlu0 %v2556_v50  ;;  %v2723_v51 = vpop.f32.mrf.mxu0 }
 0x7f5   :  { %v4000_v53 = vadd.f32 %v2723_v51, %v3788_v54 }
 0x7f6   :  { %v3429_v55 = vpop.f32.mrf.mxu0 }
 0x7f7   :  { %v2727_v56 = vsel %vm263_vm1, %v4000_v53, -inf }
 0x7f8   :  { %2728 = vmax.xlane.f32.xlu1 %v2727_v56  ;;  %v2894_v57 = vpop.f32.mrf.mxu0 }
 0x7f9   :  { %v4005_v58 = vadd.f32 %v2894_v57, %v3788_v54 }
 0x7fa   :  { %v3439_v59 = vpop.f32.mrf.mxu0 }
 0x7fb   :  { %v2898_v60 = vsel %vm263_vm1, %v4005_v58, -inf }
 0x7fc   :  { %2899 = vmax.xlane.f32.xlu0 %v2898_v60 }
 0x800   :  { %1024 = vadd.xlane.f32.xlu0 %v1023_v62 }
 0x856   :  { %v1190_v63 = vpop.xlane.xlu0 %1189 }
 0x857   :  { %v1191_v1 = vsub.f32 %v3951_v8, %v1190_v63 }
 0x859   :  { %v1192_v2 = vmul.f32 1.442695, %v1191_v1 }
 0x85b   :  { %3518 = vpow2.f32 %v1192_v2 }
 0x85e   :  { %v1361_v3 = vpop.xlane.xlu1 %1360 }
 0x85f   :  { %v1362_v4 = vsub.f32 %v3956_v12, %v1361_v3 }
 0x861   :  { %v1363_v5 = vmul.f32 1.442695, %v1362_v4 }
 0x863   :  { %3520 = vpow2.f32 %v1363_v5 }
 0x865   :  { %v1532_v6 = vpop.xlane.xlu0 %1531 }
 0x866   :  { %v1533_v7 = vsub.f32 %v3963_v18, %v1532_v6 }
 0x868   :  { %v4016_v9 = vpop.eup %3518  ;;  %v1534_v10 = vmul.f32 1.442695, %v1533_v7 }
 0x869   :  { %v1703_v11 = vpop.xlane.xlu1 %1702  ;;  %v1194_v13 = vsel %vm263_vm1, %v4016_v9, 0.0 }
 0x86a   :  { %3522 = vpow2.f32 %v1534_v10  ;;  %v1704_v8 = vsub.f32 %v3970_v25, %v1703_v11  ;;  %1195 = vadd.xlane.f32.xlu1 %v1194_v13 }
 0x86c   :  { %v1705_v14 = vmul.f32 1.442695, %v1704_v8 }
 0x86d   :  { %v1874_v16 = vpop.xlane.xlu0 %1873 }
 0x86e   :  { %3524 = vpow2.f32 %v1705_v14  ;;  %v1875_v12 = vsub.f32 %v3975_v29, %v1874_v16 }
 0x870   :  { %v4022_v17 = vpop.eup %3520  ;;  %v1876_v20 = vmul.f32 1.442695, %v1875_v12 }
 0x871   :  { %v2045_v18 = vpop.xlane.xlu1 %2044  ;;  %v1365_v21 = vsel %vm263_vm1, %v4022_v17, 0.0 }
 0x872   :  { %3526 = vpow2.f32 %v1876_v20  ;;  %v2046_v22 = vsub.f32 %v3980_v34, %v2045_v18  ;;  %1366 = vadd.xlane.f32.xlu0 %v1365_v21 }
 0x874   :  { %v2047_v23 = vmul.f32 1.442695, %v2046_v22 }
 0x875   :  { %v2216_v33 = vpop.xlane.xlu0 %2215 }
 0x876   :  { %3528 = vpow2.f32 %v2047_v23  ;;  %v2217_v34 = vsub.f32 %v3985_v39, %v2216_v33 }
 0x877   :  { %v4027_v25 = vpop.eup %3522 }
 0x878   :  { %v1536_v26 = vsel %vm263_vm1, %v4027_v25, 0.0  ;;  %v2218_v35 = vmul.f32 1.442695, %v2217_v34 }
 0x879   :  { %1537 = vadd.xlane.f32.xlu1 %v1536_v26  ;;  %v2387_v36 = vpop.xlane.xlu1 %2386 }
 0x87a   :  { %3530 = vpow2.f32 %v2218_v35  ;;  %v2388_v37 = vsub.f32 %v3990_v44, %v2387_v36 }
 0x87b   :  { %v4031_v27 = vpop.eup %3524 }
 0x87c   :  { %v1707_v28 = vsel %vm263_vm1, %v4031_v27, 0.0  ;;  %v2389_v38 = vmul.f32 1.442695, %v2388_v37 }
 0x87d   :  { %1708 = vadd.xlane.f32.xlu0 %v1707_v28  ;;  %v2558_v40 = vpop.xlane.xlu0 %2557 }
 0x87e   :  { %3532 = vpow2.f32 %v2389_v38  ;;  %v2559_v41 = vsub.f32 %v3995_v48, %v2558_v40 }
 0x87f   :  { %v4035_v29 = vpop.eup %3526 }
 0x880   :  { %v1878_v30 = vsel %vm263_vm1, %v4035_v29, 0.0  ;;  %v2560_v43 = vmul.f32 1.442695, %v2559_v41 }
 0x881   :  { %1879 = vadd.xlane.f32.xlu1 %v1878_v30  ;;  %v2729_v50 = vpop.xlane.xlu1 %2728 }
 0x882   :  { %3534 = vpow2.f32 %v2560_v43  ;;  %v2730_v51 = vsub.f32 %v4000_v53, %v2729_v50 }
 0x883   :  { %v4039_v31 = vpop.eup %3528 }
 0x884   :  { %v2049_v32 = vsel %vm263_vm1, %v4039_v31, 0.0  ;;  %v2731_v54 = vmul.f32 1.442695, %v2730_v51 }
 0x885   :  { %2050 = vadd.xlane.f32.xlu1 %v2049_v32  ;;  %v2900_v56 = vpop.xlane.xlu0 %2899 }
 0x886   :  { %3536 = vpow2.f32 %v2731_v54  ;;  %v2901_v20 = vsub.f32 %v4005_v58, %v2900_v56 }
 0x887   :  { %v4052_v42 = vpop.eup %3530 }
 0x888   :  { %v2220_v45 = vsel %vm263_vm1, %v4052_v42, 0.0  ;;  %v2902_v21 = vmul.f32 1.442695, %v2901_v20  ;;  %v3000_v20 = vld [vmem:[#allocation8 + $0x40] sm:$0xff] }
 0x889   :  { %v1025_v57 = vpop.xlane.xlu0 %1024 }
 0x88b   :  { %v4056_v39 = vpop.eup %3532 }
 0x88c   :  { %v2391_v44 = vsel %vm263_vm1, %v4056_v39, 0.0 }
 0x88f   :  { %v4063_v48 = vpop.eup %3534 }
 0x890   :  { %v2562_v49 = vsel %vm263_vm1, %v4063_v48, 0.0 }
 0x893   :  { %857 = vrot.lane.b32.xlu0 %v3784_v52, %s3688_s15  ;;  %v4072_v19 = vpop.eup %3536 }
 0x894   :  { %v2733_v55 = vsel %vm263_vm1, %v4072_v19, 0.0 }
 0x896   :  { %1028 = vrot.lane.b32.xlu1 %v3784_v52, %s3689_s16 }
 0x89a   :  { %1199 = vrot.lane.b32.xlu1 %v3784_v52, %s3690_s17 }
 0x8b2   :  { %2221 = vadd.xlane.f32.xlu0 %v2220_v45 }
 0x8be   :  { %2392 = vadd.xlane.f32.xlu1 %v2391_v44 }
 0x8c2   :  { %847 = vmax.xlane.f32.xlu1 %v846_v47 }
 0x8c6   :  { %2563 = vadd.xlane.f32.xlu1 %v2562_v49 }
 0x8c8   :  { %1370 = vrot.lane.b32.xlu0 %v3784_v52, %s3698_s26 }
 0x8d7   :  { %1541 = vrot.lane.b32.xlu1 %v3784_v52, %s3691_s18 }
 0x8e7   :  { %2734 = vadd.xlane.f32.xlu0 %v2733_v55 }
 0x8f3   :  { %v1196_v62 = vpop.xlane.xlu1 %1195 }
 0x8fb   :  { %v1367_v53 = vpop.xlane.xlu0 %1366 }
 0x8fd   :  { %1883 = vrot.lane.b32.xlu0 %v3784_v52, %s3693_s20 }
 0x901   :  { %2225 = vrot.lane.b32.xlu0 %v3784_v52, %s3695_s23 }
 0x902   :  { %v1538_v63 = vpop.xlane.xlu1 %1537 }
 0x905   :  { %2396 = vrot.lane.b32.xlu0 %v3784_v52, %s3696_s24 }
 0x906   :  { %v1709_v59 = vpop.xlane.xlu0 %1708 }
 0x909   :  { %2567 = vrot.lane.b32.xlu0 %v3784_v52, %s3678_s22 }
 0x90a   :  { %v858_v60 = vpop.permute.xlu0 %857  ;;  %v1880_v1 = vpop.xlane.xlu1 %1879 }
 0x90b   :  { %3321 = vmatpush3.msra.mxu1 %v858_v60 }
 0x90c   :  { %3330 = vmatprep.subr.mxu1 %v3684_v0 }
 0x90d   :  { %2738 = vrot.lane.b32.xlu0 %v3784_v52, %s3697_s25 }
 0x90e   :  { %v4089_v2 = vpop.xlane.xlu1 %2050 }
 0x911   :  { %592 = vrot.lane.b32.xlu0 %v3831_v24, %s3682_s8 }
 0x912   :  { %v1029_v3 = vpop.permute.xlu1 %1028 }
 0x916   :  { %v1200_v4 = vpop.permute.xlu1 %1199 }
 0x93b   :  { %v4094_v8 = vpop.xlane.xlu0 %2221 }
 0x93f   :  { %v1371_v24 = vpop.permute.xlu0 %1370 }
 0x947   :  { %v4091_v5 = vpop.xlane.xlu1 %2392 }
 0x94b   :  { %v848_v6 = vpop.xlane.xlu1 %847 }
 0x94c   :  { %v849_v7 = vsub.f32 %v843_v46, %v848_v6 }
 0x94e   :  { %v850_v10 = vmul.f32 1.442695, %v849_v7 }
 0x94f   :  { %v2564_v58 = vpop.xlane.xlu1 %2563 }
 0x950   :  { %3538 = vpow2.f32 %v850_v10 }
 0x951   :  { %3540 = vpow2.f32 %v2902_v21  ;;  %v2999_v21 = vld [vmem:[#allocation8 + $0x38] sm:$0xff] }
 0x953   :  { %v1542_v32 = vpop.permute.xlu1 %1541 }
 0x95d   :  { %v3539_v11 = vpop.eup %3538 }
 0x95e   :  { %v852_v13 = vsel %vm263_vm1, %v3539_v11, 0.0  ;;  %v4109_v28 = vpop.eup %3540 }
 0x95f   :  { %853 = vadd.xlane.f32.xlu1 %v852_v13  ;;  %v2904_v30 = vsel %vm263_vm1, %v4109_v28, 0.0 }
 0x970   :  { %v4096_v14 = vpop.xlane.xlu0 %2734  ;;  %1712 = vrot.lane.b32.xlu1 %v3784_v52, %s3692_s19 }
 0x974   :  { %v1884_v16 = vpop.permute.xlu0 %1883 }
 0x978   :  { %v4100_v12 = vpop.permute.xlu0 %2225 }
 0x97c   :  { %v4103_v18 = vpop.permute.xlu0 %2396 }
 0x980   :  { %v4105_v22 = vpop.permute.xlu0 %2567 }
 0x984   :  { %v4107_v23 = vpop.permute.xlu0 %2738 }
 0x988   :  { %v593_v26 = vpop.permute.xlu0 %592 }
 0x989   :  { %596 = vst.msk [vmem:[#allocation2] sm:$0xff] %vm595_vm2, %v593_v26 }
 0x994   :  { %2905 = vadd.xlane.f32.xlu1 %v2904_v30  ;;  %v2996_v30 = vld [vmem:[#allocation8 + $0x20] sm:$0xff] }
 0x9a5   :  { %2054 = vrot.lane.b32.xlu1 %v3784_v52, %s3694_s21 }
 0x9a9   :  { %2909 = vrot.lane.b32.xlu1 %v3784_v52, %s3682_s8 }
 0x9ad   :  { %763 = vrot.lane.b32.xlu1 %v3960_v15, %s3697_s25 }
 0x9e8   :  { %v854_v33 = vpop.xlane.xlu1 %853 }
 0x9e9   :  { %3542 = vrcp.f32 %v854_v33  ;;  %v2995_v33 = vld [vmem:[#allocation8 + $0x18] sm:$0xff] }
 0x9ea   :  { %3544 = vrcp.f32 %v1025_v57 }
 0x9eb   :  { %3546 = vrcp.f32 %v1196_v62 }
 0x9ec   :  { %3548 = vrcp.f32 %v1367_v53  ;;  %v1713_v43 = vpop.permute.xlu1 %1712 }
 0x9ed   :  { %3550 = vrcp.f32 %v1538_v63 }
 0x9ee   :  { %3552 = vrcp.f32 %v1709_v59 }
 0x9ef   :  { %3554 = vrcp.f32 %v1880_v1 }
 0x9f0   :  { %3556 = vrcp.f32 %v4089_v2  ;;  %v3007_v2 = vld [vmem:[#allocation8 + $0x78] sm:$0xff] }
 0x9f1   :  { %3558 = vrcp.f32 %v4094_v8  ;;  %3446 = vmatpush3.msra.mxu0 %v3007_v2  ;;  %v3005_v8 = vld [vmem:[#allocation8 + $0x68] sm:$0xff] }
 0x9f2   :  { %3560 = vrcp.f32 %v4091_v5  ;;  %3447 = vmatprep.subr.mxu0 %v3684_v0 }
 0x9f3   :  { %3562 = vrcp.f32 %v2564_v58 }
 0x9f4   :  { %3564 = vrcp.f32 %v4096_v14  ;;  %v3003_v14 = vld [vmem:[#allocation8 + $0x58] sm:$0xff] }
 0x9f6   :  { %v3543_v34 = vpop.eup %3542 }
 0x9f7   :  { %v856_v35 = vmul.f32 %v3543_v34, %v3539_v11  ;;  %v3545_v36 = vpop.eup %3544  ;;  %v2994_v34 = vld [vmem:[#allocation8 + $0x10] sm:$0xff] }
 0x9f8   :  { %v1027_v52 = vmul.f32 %v3545_v36, %v4009_v61  ;;  %v3547_v15 = vpop.eup %3546  ;;  %v2993_v36 = vld [vmem:[#allocation8 + $0x8] sm:$0xff] }
 0x9f9   :  { %3323 = vmatmul.mubr.msk.f32.vlgmr.msra.gmra.mxu1 %vm263_vm1, %v856_v35  ;;  %v1198_v37 = vmul.f32 %v3547_v15, %v4016_v9  ;;  %v3549_v38 = vpop.eup %3548  ;;  %v2992_v15 = vld [vmem:[#allocation8] sm:$0xff] }
 0x9fa   :  { %3331 = vmatpush3.msra.mxu1 %v1029_v3  ;;  %3332 = vmatprep.mubr.msk.f32.mxu1 %vm3685_vm0, %v3684_v0  ;;  %v1369_v61 = vmul.f32 %v3549_v38, %v4022_v17  ;;  %v3551_v40 = vpop.eup %3550  ;;  %v3006_v3 = vld [vmem:[#allocation8 + $0x70] sm:$0xff] }
 0x9fb   :  { %3340 = vmatprep.subr.mxu1 %v3684_v0  ;;  %v1540_v9 = vmul.f32 %v3551_v40, %v4027_v25  ;;  %v3553_v41 = vpop.eup %3552  ;;  %3448 = vmatpush3.msra.mxu0 %v3006_v3 }
 0x9fc   :  { %v1711_v17 = vmul.f32 %v3553_v41, %v4031_v27  ;;  %v3555_v45 = vpop.eup %3554  ;;  %3449 = vmatprep.subr.mxu0 %v3684_v0 }
 0x9fd   :  { %3333 = vmatmul.mubr.msk.f32.vlgmr.msra.gmra.mxu1 %vm263_vm1, %v1027_v52  ;;  %v1882_v25 = vmul.f32 %v3555_v45, %v4035_v29  ;;  %v3557_v46 = vpop.eup %3556  ;;  %3450 = vmatpush3.msra.mxu0 %v3005_v8 }
 0x9fe   :  { %3341 = vmatpush3.msra.mxu1 %v1200_v4  ;;  %3342 = vmatprep.mubr.msk.f32.mxu1 %vm3685_vm0, %v3684_v0  ;;  %v2053_v29 = vmul.f32 %v3557_v46, %v4039_v31  ;;  %v3559_v47 = vpop.eup %3558 }
 0x9ff   :  { %3350 = vmatprep.subr.mxu1 %v3684_v0  ;;  %v2224_v50 = vmul.f32 %v3559_v47, %v4052_v42  ;;  %v3561_v51 = vpop.eup %3560  ;;  %3451 = vmatprep.subr.mxu0 %v3684_v0 }
 0xa00   :  { %v2395_v54 = vmul.f32 %v3561_v51, %v4056_v39  ;;  %v3563_v55 = vpop.eup %3562 }
 0xa01   :  { %3343 = vmatmul.mubr.msk.f32.vlgmr.msra.gmra.mxu1 %vm263_vm1, %v1198_v37  ;;  %v2566_v42 = vmul.f32 %v3563_v55, %v4063_v48  ;;  %v3565_v56 = vpop.eup %3564 }
 0xa02   :  { %3351 = vmatpush3.msra.mxu1 %v1371_v24  ;;  %3352 = vmatprep.mubr.msk.f32.mxu1 %vm3685_vm0, %v3684_v0  ;;  %v2737_v39 = vmul.f32 %v3565_v56, %v4072_v19  ;;  %v3004_v24 = vld [vmem:[#allocation8 + $0x60] sm:$0xff] }
 0xa03   :  { %3360 = vmatprep.subr.mxu1 %v3684_v0  ;;  %3452 = vmatpush3.msra.mxu0 %v3004_v24 }
 0xa04   :  { %3453 = vmatprep.subr.mxu0 %v3684_v0 }
 0xa05   :  { %3353 = vmatmul.mubr.msk.f32.vlgmr.msra.gmra.mxu1 %vm263_vm1, %v1369_v61  ;;  %3454 = vmatpush3.msra.mxu0 %v3003_v14 }
 0xa06   :  { %3361 = vmatpush3.msra.mxu1 %v1542_v32  ;;  %3362 = vmatprep.mubr.msk.f32.mxu1 %vm3685_vm0, %v3684_v0 }
 0xa07   :  { %3370 = vmatprep.subr.mxu1 %v3684_v0  ;;  %3455 = vmatprep.subr.mxu0 %v3684_v0 }
 0xa09   :  { %3363 = vmatmul.mubr.msk.f32.vlgmr.msra.gmra.mxu1 %vm263_vm1, %v1540_v9 }
 0xa0a   :  { %3371 = vmatpush3.msra.mxu1 %v1713_v43  ;;  %3372 = vmatprep.mubr.msk.f32.mxu1 %vm3685_vm0, %v3684_v0 }
 0xa0b   :  { %3380 = vmatprep.subr.mxu1 %v3684_v0 }
 0xa0d   :  { %3373 = vmatmul.mubr.msk.f32.vlgmr.msra.gmra.mxu1 %vm263_vm1, %v1711_v17 }
 0xa0e   :  { %3381 = vmatpush3.msra.mxu1 %v1884_v16  ;;  %3382 = vmatprep.mubr.msk.f32.mxu1 %vm3685_vm0, %v3684_v0  ;;  %v3002_v16 = vld [vmem:[#allocation8 + $0x50] sm:$0xff] }
 0xa0f   :  { %3390 = vmatprep.subr.mxu1 %v3684_v0  ;;  %3456 = vmatpush3.msra.mxu0 %v3002_v16 }
 0xa10   :  { %3457 = vmatprep.subr.mxu0 %v3684_v0 }
 0xa11   :  { %3383 = vmatmul.mubr.msk.f32.vlgmr.msra.gmra.mxu1 %vm263_vm1, %v1882_v25 }
 0xa12   :  { %3392 = vmatprep.mubr.msk.f32.mxu1 %vm3685_vm0, %v3684_v0 }
 0xa1d   :  { %v2906_v27 = vpop.xlane.xlu1 %2905 }
 0xa1e   :  { %3566 = vrcp.f32 %v2906_v27 }
 0xa21   :  { %v2055_v44 = vpop.permute.xlu1 %2054 }
 0xa22   :  { %3391 = vmatpush3.msra.mxu1 %v2055_v44 }
 0xa23   :  { %3393 = vmatmul.mubr.msk.f32.vlgmr.msra.gmra.mxu1 %vm263_vm1, %v2053_v29  ;;  %3400 = vmatprep.subr.mxu1 %v3684_v0 }
 0xa24   :  { %3401 = vmatpush3.msra.mxu1 %v4100_v12  ;;  %3402 = vmatprep.mubr.msk.f32.mxu1 %vm3685_vm0, %v3684_v0  ;;  %v3001_v12 = vld [vmem:[#allocation8 + $0x48] sm:$0xff] }
 0xa25   :  { %v2910_v49 = vpop.permute.xlu1 %2909  ;;  %3410 = vmatprep.subr.mxu1 %v3684_v0  ;;  %3458 = vmatpush3.msra.mxu0 %v3001_v12 }
 0xa26   :  { %3459 = vmatprep.subr.mxu0 %v3684_v0 }
 0xa27   :  { %3403 = vmatmul.mubr.msk.f32.vlgmr.msra.gmra.mxu1 %vm263_vm1, %v2224_v50  ;;  %3460 = vmatpush3.msra.mxu0 %v3000_v20 }
 0xa28   :  { %3411 = vmatpush3.msra.mxu1 %v4103_v18  ;;  %3412 = vmatprep.mubr.msk.f32.mxu1 %vm3685_vm0, %v3684_v0 }
 0xa29   :  { %v764_v31 = vpop.permute.xlu1 %763  ;;  %3420 = vmatprep.subr.mxu1 %v3684_v0  ;;  %3461 = vmatprep.subr.mxu0 %v3684_v0 }
 0xa2a   :  { %767 = vst.msk [vmem:[#allocation2] sm:$0xff] %vm766_vm3, %v764_v31  ;;  %3462 = vmatpush3.msra.mxu0 %v2999_v21  ;;  %v3151_v31 = vld [vmem:[%s4224_s3] ss:$0 sm:$0xff] }
 0xa2b   :  { %3413 = vmatmul.mubr.msk.f32.vlgmr.msra.gmra.mxu1 %vm263_vm1, %v2395_v54  ;;  %v3567_v57 = vpop.eup %3566  ;;  %3463 = vmatprep.subr.mxu0 %v3684_v0 }
 0xa2c   :  { %3421 = vmatpush3.msra.mxu1 %v4105_v22  ;;  %3422 = vmatprep.mubr.msk.f32.mxu1 %vm3685_vm0, %v3684_v0  ;;  %v2908_v48 = vmul.f32 %v3567_v57, %v4109_v28  ;;  %v2998_v22 = vld [vmem:[#allocation8 + $0x30] sm:$0xff]  ;;  %v2997_v28 = vld [vmem:[#allocation8 + $0x28] sm:$0xff] }
 0xa2d   :  { %3430 = vmatprep.subr.mxu1 %v3684_v0  ;;  %3464 = vmatpush3.msra.mxu0 %v2998_v22 }
 0xa2e   :  { %3465 = vmatprep.subr.mxu0 %v3684_v0 }
 0xa2f   :  { %3423 = vmatmul.mubr.msk.f32.vlgmr.msra.gmra.mxu1 %vm263_vm1, %v2566_v42  ;;  %3466 = vmatpush3.msra.mxu0 %v2997_v28 }
 0xa30   :  { %3431 = vmatpush3.msra.mxu1 %v4107_v23  ;;  %3432 = vmatprep.mubr.msk.f32.mxu1 %vm3685_vm0, %v3684_v0 }
 0xa31   :  { %3440 = vmatprep.subr.mxu1 %v3684_v0  ;;  %3467 = vmatprep.subr.mxu0 %v3684_v0 }
 0xa32   :  { %3468 = vmatpush3.msra.mxu0 %v2996_v30 }
 0xa33   :  { %3433 = vmatmul.mubr.msk.f32.vlgmr.msra.gmra.mxu1 %vm263_vm1, %v2737_v39  ;;  %3469 = vmatprep.subr.mxu0 %v3684_v0 }
 0xa34   :  { %3441 = vmatpush3.msra.mxu1 %v2910_v49  ;;  %3442 = vmatprep.mubr.msk.f32.mxu1 %vm3685_vm0, %v3684_v0  ;;  %vm2989_vm0 = vcmask 1048512  }
 0xa35   :  { %3470 = vmatpush3.msra.mxu0 %v2995_v33 }
 0xa36   :  { %3471 = vmatprep.subr.mxu0 %v3684_v0 }
 0xa37   :  { %3443 = vmatmul.mubr.msk.f32.vlgmr.msra.gmra.mxu1 %vm263_vm1, %v2908_v48  ;;  %3472 = vmatpush3.msra.mxu0 %v2994_v34 }
 0xa38   :  { %3473 = vmatprep.subr.mxu0 %v3684_v0 }
 0xa39   :  { %3474 = vmatpush3.msra.mxu0 %v2993_v36 }
 0xa3a   :  { %3475 = vmatprep.subr.mxu0 %v3684_v0 }
 0xa3b   :  { %3476 = vmatpush3.msra.mxu0 %v2992_v15 }
 0xab9   :  { %v929_v53 = vpop.f32.mrf.mxu1 }
 0xaba   :  { %934 = vrot.lane.b32.xlu0 %v929_v53, %s3678_s22 }
 0xabb   :  { %v3324_v59 = vpop.f32.mrf.mxu1 }
 0xabd   :  { %v1100_v60 = vpop.f32.mrf.mxu1 }
 0xabe   :  { %1105 = vrot.lane.b32.xlu1 %v1100_v60, %s3696_s24 }
 0xabf   :  { %v3334_v62 = vpop.f32.mrf.mxu1 }
 0xac1   :  { %v1271_v19 = vpop.f32.mrf.mxu1 }
 0xac2   :  { %1276 = vrot.lane.b32.xlu0 %v1271_v19, %s3695_s23 }
 0xac3   :  { %v3344_v63 = vpop.f32.mrf.mxu1 }
 0xac5   :  { %v1442_v1 = vpop.f32.mrf.mxu1 }
 0xac6   :  { %1447 = vrot.lane.b32.xlu1 %v1442_v1, %s3694_s21 }
 0xac7   :  { %v3354_v4 = vpop.f32.mrf.mxu1 }
 0xac9   :  { %v1613_v5 = vpop.f32.mrf.mxu1 }
 0xaca   :  { %1618 = vrot.lane.b32.xlu0 %v1613_v5, %s3693_s20 }
 0xacb   :  { %v3364_v6 = vpop.f32.mrf.mxu1 }
 0xacd   :  { %v1784_v7 = vpop.f32.mrf.mxu1 }
 0xace   :  { %1789 = vrot.lane.b32.xlu1 %v1784_v7, %s3692_s19 }
 0xacf   :  { %v3374_v10 = vpop.f32.mrf.mxu1 }
 0xad1   :  { %v1955_v11 = vpop.f32.mrf.mxu1 }
 0xad2   :  { %1960 = vrot.lane.b32.xlu0 %v1955_v11, %s3691_s18 }
 0xad3   :  { %v3384_v13 = vpop.f32.mrf.mxu1 }
 0xae3   :  { %v2126_v18 = vpop.f32.mrf.mxu1 }
 0xae4   :  { %2131 = vrot.lane.b32.xlu1 %v2126_v18, %s3698_s26 }
 0xae5   :  { %v3394_v23 = vpop.f32.mrf.mxu1 }
 0xae7   :  { %v2297_v26 = vpop.f32.mrf.mxu1 }
 0xae8   :  { %2302 = vrot.lane.b32.xlu0 %v2297_v26, %s3690_s17 }
 0xae9   :  { %v3404_v58 = vpop.f32.mrf.mxu1 }
 0xaeb   :  { %v2468_v32 = vpop.f32.mrf.mxu1 }
 0xaec   :  { %2473 = vrot.lane.b32.xlu1 %v2468_v32, %s3689_s16 }
 0xaed   :  { %v3414_v35 = vpop.f32.mrf.mxu1 }
 0xaef   :  { %v2639_v52 = vpop.f32.mrf.mxu1 }
 0xaf0   :  { %2644 = vrot.lane.b32.xlu0 %v2639_v52, %s3688_s15 }
 0xaf1   :  { %v3424_v37 = vpop.f32.mrf.mxu1 }
 0xaf3   :  { %v2810_v38 = vpop.f32.mrf.mxu1 }
 0xaf4   :  { %2815 = vrot.lane.b32.xlu1 %v2810_v38, %s3687_s4 }
 0xaf5   :  { %v3434_v61 = vpop.f32.mrf.mxu1 }
 0xaf7   :  { %v2981_v40 = vpop.f32.mrf.mxu1 }
 0xaf8   :  { %2986 = vrot.lane.b32.xlu0 %v2981_v40, %s3686_s2 }
 0xaf9   :  { %v3444_v9 = vpop.f32.mrf.mxu1 }
 0xb2c   :  { %v935_v41 = vpop.permute.xlu0 %934 }
 0xb2d   :  { %938 = vst.msk [vmem:[#allocation2] sm:$0xff] %vm937_vm4, %v935_v41 }
 0xb30   :  { %v1106_v43 = vpop.permute.xlu1 %1105 }
 0xb31   :  { %1109 = vst.msk [vmem:[#allocation2] sm:$0xff] %vm1108_vm5, %v1106_v43 }
 0xb34   :  { %v1277_v17 = vpop.permute.xlu0 %1276 }
 0xb35   :  { %1280 = vst.msk [vmem:[#allocation2] sm:$0xff] %vm1279_vm6, %v1277_v17 }
 0xb38   :  { %v1448_v0 = vpop.permute.xlu1 %1447 }
 0xb39   :  { %1451 = vst.msk [vmem:[#allocation2] sm:$0xff] %vm1450_vm7, %v1448_v0 }
 0xb3c   :  { %v1619_v45 = vpop.permute.xlu0 %1618 }
 0xb3d   :  { %1622 = vst.msk [vmem:[#allocation2] sm:$0xff] %vm1621_vm8, %v1619_v45 }
 0xb40   :  { %v1790_v25 = vpop.permute.xlu1 %1789 }
 0xb41   :  { %1793 = vst.msk [vmem:[#allocation2] sm:$0xff] %vm1792_vm9, %v1790_v25 }
 0xb44   :  { %v1961_v27 = vpop.permute.xlu0 %1960 }
 0xb45   :  { %1964 = vst.msk [vmem:[#allocation2] sm:$0xff] %vm1963_vm10, %v1961_v27 }
 0xb56   :  { %v2132_v46 = vpop.permute.xlu1 %2131 }
 0xb57   :  { %2135 = vst.msk [vmem:[#allocation2] sm:$0xff] %vm2134_vm11, %v2132_v46 }
 0xb5a   :  { %v2303_v44 = vpop.permute.xlu0 %2302 }
 0xb5b   :  { %2306 = vst.msk [vmem:[#allocation2] sm:$0xff] %vm2305_vm12, %v2303_v44 }
 0xb5e   :  { %v2474_v29 = vpop.permute.xlu1 %2473 }
 0xb5f   :  { %2477 = vst.msk [vmem:[#allocation2] sm:$0xff] %vm2476_vm13, %v2474_v29 }
 0xb62   :  { %v2645_v47 = vpop.permute.xlu0 %2644 }
 0xb63   :  { %2648 = vst.msk [vmem:[#allocation2] sm:$0xff] %vm2647_vm14, %v2645_v47 }
 0xb66   :  { %v2816_v49 = vpop.permute.xlu1 %2815 }
 0xb67   :  { %2819 = vst.msk [vmem:[#allocation2] sm:$0xff] %vm2818_vm15, %v2816_v49 }
 0xb6a   :  { %v2987_v50 = vpop.permute.xlu0 %2986 }
 0xb6b   :  { %2990 = vst.msk [vmem:[#allocation2] sm:$0xff] %vm2989_vm0, %v2987_v50 }
 0xb72   :  { %v2991_v51 = vld [vmem:[#allocation2] sm:$0xff] }
 0xb73   :  { %3478 = vmatmul.mubr.f32.vlgmr.msra.gmra.mxu0 %v2991_v51 }
 0xc33   :  { %v3081_v54 = vpop.f32.mrf.mxu0 }
 0xc34   :  { %v3082_v55 = vadd.f32 %v3151_v31, %v3081_v54 }
 0xc35   :  { %v3479_v42 = vpop.f32.mrf.mxu0 }
 0xc36   :  { %3085 = vst [vmem:[#allocation11] sm:$0xff] %v3082_v55 }
 0xc37   :  { %3659 = shalt.err (!%p3656_p10)
}
 0xc38   :  { %3095 = dma.vmem_to_hbm [thread:$0]  %s3093_s29, 128, %s4226_s5, [#allocation5]  }
 0xc39   :  { %3674 = dma.done.wait [#allocation5], 128  }
 0xc3a   :  { %3675 = vsyncadd [#allocation5], 4294967168 }
 0xc3b   :  { %3099 = vsyncpa [#allocation4], 1 }
 0xc3c   :  { %3100 = vsyncpa [#allocation7], 1 }
 0xc3d   :  { %3101 = vsyncpa [#allocation10], 1 }
 0xc3e   :  { %3102 = vsyncpa [#allocation5], 1 }

</bundles_post_ra>
